<compile_context>
chip_gen: v7x
topology: tpu7x:2x2x1
jax: 0.10.0
libtpu: 0.0.40
codegen_flags: <defaults>
</compile_context>

<pallas_src>
from functools import partial

import jax
import jax.numpy as jnp
import numpy as np
from jax.experimental import pallas as pl
from jax.experimental.pallas import tpu as pltpu


GATE_PERM = (0, 1, 3, 2)   # PyTorch gate order (i, f, g, o) -> kernel order (i, f, o, g)


# ----------------------------------------------------------------------------
# Weight preparation (tiny, done once per call in XLA).
# Combined gate-column layout: [i_f,i_b, f_f,f_b, o_f,o_b, g_f,g_b], blocks of H.
# ----------------------------------------------------------------------------
def _interleave_ih(wih_f, wih_b):
    """(4H, Din) x 2 -> (Din, 8H) with interleaved fwd/bwd gate columns."""
    four_h, d = wih_f.shape
    h = four_h // 4
    wf = wih_f.reshape(4, h, d)
    wb = wih_b.reshape(4, h, d)
    wf = jnp.stack([wf[g] for g in GATE_PERM], axis=0)
    wb = jnp.stack([wb[g] for g in GATE_PERM], axis=0)
    w = jnp.stack([wf, wb], axis=1)                  # (4, 2, h, d)
    return w.reshape(8 * h, d).T                     # (Din, 8H)


def _interleave_bias(b_f, b_b):
    """(4H,) x 2 -> (1, 8H) interleaved."""
    h = b_f.shape[0] // 4
    bf = b_f.reshape(4, h)
    bb = b_b.reshape(4, h)
    bf = jnp.stack([bf[g] for g in GATE_PERM], axis=0)
    bb = jnp.stack([bb[g] for g in GATE_PERM], axis=0)
    return jnp.stack([bf, bb], axis=1).reshape(1, 8 * h)


def _make_whh_bd(whh_f, whh_b):
    """Block-diagonal recurrent weights (2H, 8H): rows 0:H see h_fwd, rows H:2H
    see h_bwd; fwd gate columns only read h_fwd, bwd columns only h_bwd."""
    h = whh_f.shape[1]
    z = jnp.zeros((h, h), jnp.float32)
    cols = []
    for g in GATE_PERM:
        cols.append(jnp.concatenate([whh_f[g * h:(g + 1) * h, :].T, z], axis=0))
        cols.append(jnp.concatenate([z, whh_b[g * h:(g + 1) * h, :].T], axis=0))
    return jnp.concatenate(cols, axis=1)             # (2H, 8H)


# ----------------------------------------------------------------------------
# The fused kernel.
# ----------------------------------------------------------------------------
def _lstm_double_kernel(xcat_ref, wbig_ref, biasfc_ref, fcmat_ref,
                        y_ref,
                        gx_scr, a1_scr, a1r_scr, accf_scr, accb_scr):
    _tb, two_d = xcat_ref.shape
    H8 = wbig_ref.shape[1]
    H = H8 // 8
    H2, H4, H6 = 2 * H, 4 * H, 6 * H
    B, T = accf_scr.shape
    f32 = jnp.float32

    # ---- layer-1 input projection for ALL timesteps, pre-folded -------------
    # xcat rows are (t*B + b); cols [0:D] = x(t), [D:2D] = x(T-1-t).  w1ab has
    # the fwd gate columns masked into its top D rows and the bwd gate columns
    # into its bottom D rows, so one matmul yields the "folded" pre-activations
    # the fused fwd+bwd recurrence consumes at step s.
    w1ab = wbig_ref[H8:H8 + two_d, :]                # (2D, 8H)
    b1 = biasfc_ref[0:1, :]                          # (1, 8H)
    gx_scr[...] = jnp.dot(xcat_ref[...], w1ab, preferred_element_type=f32) + b1

    fcmat = fcmat_ref[...]                           # (2H, 128); col 0 = fwd fc, col 1 = bwd fc

    def bi_lstm(whh, h0, c0, is_layer1):
        h, c = h0, c0                                # (B, 2H) = [h_fwd | h_bwd]
        for s in range(T):                           # static unroll
            gx = gx_scr[pl.ds(s * B, B), :]          # (B, 8H) folded pre-activations
            gates = gx + jnp.dot(h, whh, preferred_element_type=f32)
            sig = jax.nn.sigmoid(gates[:, 0:H6])     # i, f, o in one contiguous pass
            i_g = sig[:, 0:H2]
            f_g = sig[:, H2:H4]
            o_g = sig[:, H4:H6]
            g_g = jnp.tanh(gates[:, H6:H8])
            c = f_g * c + i_g * g_g
            h = o_g * jnp.tanh(c)
            if is_layer1:
                # Store the full (B, 2H) h twice: time-ordered and time-reversed,
                # so the layer-2 projection is one batched matmul (no flips, no
                # per-half lane extraction on the recurrent chain).
                a1_scr[pl.ds(s * B, B), :] = h
                a1r_scr[pl.ds((T - 1 - s) * B, B), :] = h
            else:
                # Fused fc2: project this step's h to its two output scalars per
                # batch (fwd -> time s, bwd -> time T-1-s) and write them as
                # columns of the (B, T) accumulators -> output is built directly
                # in final layout.
                yfb = jnp.dot(h, fcmat, preferred_element_type=f32)   # (B, 128)
                accf_scr[:, s:s + 1] = yfb[:, 0:1]
                accb_scr[:, T - 1 - s:T - s] = yfb[:, 1:2]
        return h, c

    # ---- layer 1 (zero initial state) ---------------------------------------
    zeros = jnp.zeros((B, H2), f32)
    whh1 = wbig_ref[0:H2, :]                         # hoisted out of the loop
    h1, c1 = bi_lstm(whh1, zeros, zeros, True)

    # ---- layer-2 input projection: one batched, pre-folded matmul -----------
    w2ab = wbig_ref[H4:H8, :]                        # (4H, 8H)
    b2 = biasfc_ref[1:2, :]
    a_cat = jnp.concatenate([a1_scr[...], a1r_scr[...]], axis=1)     # (T*B, 4H)
    gx_scr[...] = jnp.dot(a_cat, w2ab, preferred_element_type=f32) + b2

    # ---- layer 2: initial state = layer-1 final (h_n, c_n) (module semantics:
    #      lstm2(lstm_out, lstm_c) passes layer 1's (h_n, c_n) as (h_0, c_0)) --
    whh2 = wbig_ref[H2:H4, :]
    bi_lstm(whh2, h1, c1, False)

    # ---- fc2 bias + tanh epilogue, written once in (B, T) layout ------------
    fc_b = biasfc_ref[2:3, 0:1]                      # (1, 1)
    y_ref[...] = jnp.tanh(accf_scr[...] + accb_scr[...] + fc_b)


# ----------------------------------------------------------------------------
# Full forward pass (matches lstm_double.forward).
# ----------------------------------------------------------------------------
@partial(jax.jit, static_argnames=("hidden_dim",))
def lstm_double_forward(x, params, hidden_dim):
    B, T, D = x.shape
    H = hidden_dim
    H2, H4, H8 = 2 * H, 4 * H, 8 * H
    f32 = jnp.float32

    # --- interleaved / block-diagonal weights (gate blocks i, f, o, g) ---
    wih1 = _interleave_ih(params["l1_fwd"]["w_ih"], params["l1_bwd"]["w_ih"])   # (D, 8H)
    b1 = _interleave_bias(params["l1_fwd"]["b_ih"] + params["l1_fwd"]["b_hh"],
                          params["l1_bwd"]["b_ih"] + params["l1_bwd"]["b_hh"])  # (1, 8H)
    whh1 = _make_whh_bd(params["l1_fwd"]["w_hh"], params["l1_bwd"]["w_hh"])     # (2H, 8H)

    wih2 = _interleave_ih(params["l2_fwd"]["w_ih"], params["l2_bwd"]["w_ih"])   # (2H, 8H)
    b2 = _interleave_bias(params["l2_fwd"]["b_ih"] + params["l2_fwd"]["b_hh"],
                          params["l2_bwd"]["b_ih"] + params["l2_bwd"]["b_hh"])  # (1, 8H)
    whh2 = _make_whh_bd(params["l2_fwd"]["w_hh"], params["l2_bwd"]["w_hh"])     # (2H, 8H)

    # --- fold the fwd/bwd time reversal into the input-projection weights ---
    fwd_cols = jnp.asarray((np.arange(H8) // H) % 2 == 0, f32)[None, :]         # (1, 8H)
    bwd_cols = 1.0 - fwd_cols
    w1ab = jnp.concatenate([wih1 * fwd_cols, wih1 * bwd_cols], axis=0)          # (2D, 8H)
    w2a = jnp.concatenate([wih2[0:H] * fwd_cols, wih2[H:H2] * bwd_cols], axis=0)
    w2b = jnp.concatenate([wih2[0:H] * bwd_cols, wih2[H:H2] * fwd_cols], axis=0)
    w2ab = jnp.concatenate([w2a, w2b], axis=0)                                  # (4H, 8H)

    # --- pack weights / biases into few operands (fewer prologue DMAs) ---
    wbig = jnp.concatenate([whh1, whh2, w2ab, w1ab], axis=0)                    # (8H+2D, 8H)
    fc_b_row = jnp.zeros((1, H8), f32).at[0, 0].set(params["fc_b"][0])
    biasfc = jnp.concatenate([b1, b2, fc_b_row], axis=0)                        # (3, 8H)

    fc_w = params["fc_w"].reshape(H2).astype(f32)
    fcmat = jnp.zeros((H2, 128), f32)
    fcmat = fcmat.at[0:H, 0].set(fc_w[0:H])                                     # fwd fc -> col 0
    fcmat = fcmat.at[H:H2, 1].set(fc_w[H:H2])                                   # bwd fc -> col 1

    # --- time-major input with its time-reversed copy as extra columns ---
    x_tbd = jnp.transpose(x, (1, 0, 2)).astype(f32)                             # (T, B, D)
    xcat = jnp.concatenate([x_tbd, x_tbd[::-1]], axis=-1).reshape(T * B, 2 * D)

    vmem = pl.BlockSpec(memory_space=pltpu.MemorySpace.VMEM)
    y_bt = pl.pallas_call(
        _lstm_double_kernel,
        out_shape=jax.ShapeDtypeStruct((B, T), f32),
        in_specs=[vmem] * 4,
        out_specs=vmem,
        scratch_shapes=[
            pltpu.VMEM((T * B, H8), f32),   # gate pre-activations (reused by both layers)
            pltpu.VMEM((T * B, H2), f32),   # layer-1 h, time-ordered rows (t*B + b)
            pltpu.VMEM((T * B, H2), f32),   # layer-1 h, time-reversed rows
            pltpu.VMEM((B, T), f32),        # fc fwd-direction contributions
            pltpu.VMEM((B, T), f32),        # fc bwd-direction contributions
        ],
    )(xcat, wbig, biasfc, fcmat)

    # fc output feature dim is 1, so flatten(1).unsqueeze(1) == (B, 1, T).
    return y_bt[:, None, :]


# ----------------------------------------------------------------------------
# Parameter init (deterministic, PyTorch-style U(-1/sqrt(H), 1/sqrt(H))).
# ----------------------------------------------------------------------------
def init_params(key, input_dim, hidden_dim):
    H = hidden_dim
    bound = 1.0 / float(np.sqrt(H))
    keys = jax.random.split(key, 20)

    def u(kk, shape):
        return jax.random.uniform(kk, shape, jnp.float32, -bound, bound)

    params = {}
    idx = 0
    for layer, in_dim in ((1, input_dim), (2, 2 * H)):
        for direction in ("fwd", "bwd"):
            params[f"l{layer}_{direction}"] = dict(
                w_ih=u(keys[idx + 0], (4 * H, in_dim)),
                w_hh=u(keys[idx + 1], (4 * H, H)),
                b_ih=u(keys[idx + 2], (4 * H,)),
                b_hh=u(keys[idx + 3], (4 * H,)),
            )
            idx += 4
    params["fc_w"] = u(keys[idx], (1, 2 * H))
    params["fc_b"] = u(keys[idx + 1], (1,))
    return params


# ----------------------------------------------------------------------------
# Pure-JAX reference (lax.scan) used as a correctness oracle.
# ----------------------------------------------------------------------------
def _ref_lstm_dir(x_tbd, p, h0, c0, reverse):
    wih, whh = p["w_ih"], p["w_hh"]
    b = p["b_ih"] + p["b_hh"]
    H = whh.shape[-1]
    xs = x_tbd[::-1] if reverse else x_tbd

    def step(carry, x_t):
        h, c = carry
        gates = x_t @ wih.T + h @ whh.T + b
        i = jax.nn.sigmoid(gates[:, :H])
        f = jax.nn.sigmoid(gates[:, H:2 * H])
        g = jnp.tanh(gates[:, 2 * H:3 * H])
        o = jax.nn.sigmoid(gates[:, 3 * H:4 * H])
        c = f * c + i * g
        h = o * jnp.tanh(c)
        return (h, c), h

    (hn, cn), hs = jax.lax.scan(step, (h0, c0), xs)
    if reverse:
        hs = hs[::-1]
    return hs, hn, cn


def _ref_forward(x, params, hidden_dim):
    B, T, _ = x.shape
    H = hidden_dim
    x_tbd = jnp.transpose(x, (1, 0, 2))
    zeros = jnp.zeros((B, H), jnp.float32)
    hs1_f, hn_f, cn_f = _ref_lstm_dir(x_tbd, params["l1_fwd"], zeros, zeros, False)
    hs1_b, hn_b, cn_b = _ref_lstm_dir(x_tbd, params["l1_bwd"], zeros, zeros, True)
    out1 = jnp.concatenate([hs1_f, hs1_b], axis=-1)
    hs2_f, _, _ = _ref_lstm_dir(out1, params["l2_fwd"], hn_f, cn_f, False)
    hs2_b, _, _ = _ref_lstm_dir(out1, params["l2_bwd"], hn_b, cn_b, True)
    out2 = jnp.concatenate([hs2_f, hs2_b], axis=-1)
    y = jnp.tanh(jnp.transpose(out2, (1, 0, 2)) @ params["fc_w"].T
                 + params["fc_b"])                               # (B, T, 1)
    return y.reshape(B, T)[:, None, :]


if __name__ == "__main__":
    B, T, INPUT_DIM, HIDDEN_DIM = 2, 8, 4, 32

    key = jax.random.PRNGKey(0)
    k_x, k_p = jax.random.split(key)
    x = jax.random.normal(k_x, (B, T, INPUT_DIM), dtype=jnp.float32)
    params = init_params(k_p, INPUT_DIM, HIDDEN_DIM)

    out = jax.block_until_ready(lstm_double_forward(x, params, HIDDEN_DIM))
    assert out.shape == (B, 1, T), out.shape

    ref = jax.block_until_ready(_ref_forward(x, params, HIDDEN_DIM))
    np.testing.assert_allclose(np.asarray(out), np.asarray(ref),
                               rtol=1e-4, atol=1e-4)

    print("KERNEL_OK")
</pallas_src>

<mosaic_0001>
module attributes {stable_mosaic.version = 11 : i64} {
  func.func @_lstm_double_kernel(%arg0: memref<16x8xf32, #tpu.memory_space<vmem>>, %arg1: memref<264x256xf32, #tpu.memory_space<vmem>>, %arg2: memref<3x256xf32, #tpu.memory_space<vmem>>, %arg3: memref<64x128xf32, #tpu.memory_space<vmem>>, %arg4: memref<2x8xf32, #tpu.memory_space<vmem>>, %arg5: memref<16x256xf32, #tpu.memory_space<vmem>>, %arg6: memref<16x64xf32, #tpu.memory_space<vmem>>, %arg7: memref<16x64xf32, #tpu.memory_space<vmem>>, %arg8: memref<2x8xf32, #tpu.memory_space<vmem>>, %arg9: memref<2x8xf32, #tpu.memory_space<vmem>>) attributes {dimension_semantics = [], scalar_prefetch = 0 : i64, scratch_operands = 5 : i64, tpu.core_type = #tpu.core_type<tc>} {
    %c256 = arith.constant 256 : index
    %c0 = arith.constant 0 : index
    %0 = vector.load %arg1[%c256, %c0] : memref<264x256xf32, #tpu.memory_space<vmem>>, vector<8x256xf32>
    %c0_0 = arith.constant 0 : index
    %c0_1 = arith.constant 0 : index
    %1 = vector.load %arg2[%c0_0, %c0_1] : memref<3x256xf32, #tpu.memory_space<vmem>>, vector<1x256xf32>
    %c0_2 = arith.constant 0 : index
    %c0_3 = arith.constant 0 : index
    %2 = vector.load %arg0[%c0_2, %c0_3] : memref<16x8xf32, #tpu.memory_space<vmem>>, vector<16x8xf32>
    %cst = arith.constant dense<0.000000e+00> : vector<16x256xf32>
    %3 = tpu.matmul %2, %0, %cst {dimension_numbers = #tpu.dot_dimension_numbers<[1], [0], [0], [1], [0, 0, 1, 1], [], []>} : vector<16x8xf32>, vector<8x256xf32>, vector<16x256xf32> -> vector<16x256xf32>
    %4 = vector.broadcast %1 : vector<1x256xf32> to vector<16x256xf32>
    %5 = arith.addf %3, %4 : vector<16x256xf32>
    %c0_4 = arith.constant 0 : index
    %c0_5 = arith.constant 0 : index
    %6 = vector.load %arg5[%c0_4, %c0_5] : memref<16x256xf32, #tpu.memory_space<vmem>>, vector<16x256xf32>
    tpu.vector_store %arg5[%c0_4, %c0_5], %5 {strides = array<i32>} : memref<16x256xf32, #tpu.memory_space<vmem>>, vector<16x256xf32>,
    %c0_6 = arith.constant 0 : index
    %c0_7 = arith.constant 0 : index
    %7 = vector.load %arg3[%c0_6, %c0_7] : memref<64x128xf32, #tpu.memory_space<vmem>>, vector<64x128xf32>
    %cst_8 = arith.constant 0.000000e+00 : f32
    %8 = vector.broadcast %cst_8 : f32 to vector<2x64xf32>
    %c0_9 = arith.constant 0 : index
    %c0_10 = arith.constant 0 : index
    %9 = vector.load %arg1[%c0_9, %c0_10] : memref<264x256xf32, #tpu.memory_space<vmem>>, vector<64x256xf32>
    %c0_11 = arith.constant 0 : index
    %c0_12 = arith.constant 0 : index
    %10 = vector.load %arg5[%c0_11, %c0_12] : memref<16x256xf32, #tpu.memory_space<vmem>>, vector<2x256xf32>
    %cst_13 = arith.constant dense<0.000000e+00> : vector<2x256xf32>
    %11 = tpu.matmul %8, %9, %cst_13 {dimension_numbers = #tpu.dot_dimension_numbers<[1], [0], [0], [1], [0, 0, 1, 1], [], []>} : vector<2x64xf32>, vector<64x256xf32>, vector<2x256xf32> -> vector<2x256xf32>
    %12 = arith.addf %10, %11 : vector<2x256xf32>
    %13 = vector.extract_strided_slice %12 {offsets = [0, 0], sizes = [2, 192], strides = [1, 1]} : vector<2x256xf32> to vector<2x192xf32>
    %14 = arith.negf %13 : vector<2x192xf32>
    %15 = math.exp %14 : vector<2x192xf32>
    %cst_14 = arith.constant 1.000000e+00 : f32
    %16 = vector.broadcast %cst_14 : f32 to vector<2x192xf32>
    %17 = arith.addf %16, %15 : vector<2x192xf32>
    %18 = arith.divf %16, %17 : vector<2x192xf32>
    %19 = vector.extract_strided_slice %18 {offsets = [0, 0], sizes = [2, 64], strides = [1, 1]} : vector<2x192xf32> to vector<2x64xf32>
    %20 = vector.extract_strided_slice %18 {offsets = [0, 64], sizes = [2, 64], strides = [1, 1]} : vector<2x192xf32> to vector<2x64xf32>
    %21 = vector.extract_strided_slice %18 {offsets = [0, 128], sizes = [2, 64], strides = [1, 1]} : vector<2x192xf32> to vector<2x64xf32>
    %22 = vector.extract_strided_slice %12 {offsets = [0, 192], sizes = [2, 64], strides = [1, 1]} : vector<2x256xf32> to vector<2x64xf32>
    %23 = math.tanh %22 : vector<2x64xf32>
    %24 = arith.mulf %20, %8 : vector<2x64xf32>
    %25 = arith.mulf %19, %23 : vector<2x64xf32>
    %26 = arith.addf %24, %25 : vector<2x64xf32>
    %27 = math.tanh %26 : vector<2x64xf32>
    %28 = arith.mulf %21, %27 : vector<2x64xf32>
    %c0_15 = arith.constant 0 : index
    %c0_16 = arith.constant 0 : index
    %29 = vector.load %arg6[%c0_15, %c0_16] : memref<16x64xf32, #tpu.memory_space<vmem>>, vector<2x64xf32>
    tpu.vector_store %arg6[%c0_15, %c0_16], %28 {strides = array<i32>} : memref<16x64xf32, #tpu.memory_space<vmem>>, vector<2x64xf32>,
    %c14 = arith.constant 14 : index
    %c0_17 = arith.constant 0 : index
    %30 = vector.load %arg7[%c14, %c0_17] : memref<16x64xf32, #tpu.memory_space<vmem>>, vector<2x64xf32>
    tpu.vector_store %arg7[%c14, %c0_17], %28 {strides = array<i32>} : memref<16x64xf32, #tpu.memory_space<vmem>>, vector<2x64xf32>,
    %c2 = arith.constant 2 : index
    %c0_18 = arith.constant 0 : index
    %31 = vector.load %arg5[%c2, %c0_18] : memref<16x256xf32, #tpu.memory_space<vmem>>, vector<2x256xf32>
    %cst_19 = arith.constant dense<0.000000e+00> : vector<2x256xf32>
    %32 = tpu.matmul %28, %9, %cst_19 {dimension_numbers = #tpu.dot_dimension_numbers<[1], [0], [0], [1], [0, 0, 1, 1], [], []>} : vector<2x64xf32>, vector<64x256xf32>, vector<2x256xf32> -> vector<2x256xf32>
    %33 = arith.addf %31, %32 : vector<2x256xf32>
    %34 = vector.extract_strided_slice %33 {offsets = [0, 0], sizes = [2, 192], strides = [1, 1]} : vector<2x256xf32> to vector<2x192xf32>
    %35 = arith.negf %34 : vector<2x192xf32>
    %36 = math.exp %35 : vector<2x192xf32>
    %cst_20 = arith.constant 1.000000e+00 : f32
    %37 = vector.broadcast %cst_20 : f32 to vector<2x192xf32>
    %38 = arith.addf %37, %36 : vector<2x192xf32>
    %39 = arith.divf %37, %38 : vector<2x192xf32>
    %40 = vector.extract_strided_slice %39 {offsets = [0, 0], sizes = [2, 64], strides = [1, 1]} : vector<2x192xf32> to vector<2x64xf32>
    %41 = vector.extract_strided_slice %39 {offsets = [0, 64], sizes = [2, 64], strides = [1, 1]} : vector<2x192xf32> to vector<2x64xf32>
    %42 = vector.extract_strided_slice %39 {offsets = [0, 128], sizes = [2, 64], strides = [1, 1]} : vector<2x192xf32> to vector<2x64xf32>
    %43 = vector.extract_strided_slice %33 {offsets = [0, 192], sizes = [2, 64], strides = [1, 1]} : vector<2x256xf32> to vector<2x64xf32>
    %44 = math.tanh %43 : vector<2x64xf32>
    %45 = arith.mulf %41, %26 : vector<2x64xf32>
    %46 = arith.mulf %40, %44 : vector<2x64xf32>
    %47 = arith.addf %45, %46 : vector<2x64xf32>
    %48 = math.tanh %47 : vector<2x64xf32>
    %49 = arith.mulf %42, %48 : vector<2x64xf32>
    %c2_21 = arith.constant 2 : index
    %c0_22 = arith.constant 0 : index
    %50 = vector.load %arg6[%c2_21, %c0_22] : memref<16x64xf32, #tpu.memory_space<vmem>>, vector<2x64xf32>
    tpu.vector_store %arg6[%c2_21, %c0_22], %49 {strides = array<i32>} : memref<16x64xf32, #tpu.memory_space<vmem>>, vector<2x64xf32>,
    %c12 = arith.constant 12 : index
    %c0_23 = arith.constant 0 : index
    %51 = vector.load %arg7[%c12, %c0_23] : memref<16x64xf32, #tpu.memory_space<vmem>>, vector<2x64xf32>
    tpu.vector_store %arg7[%c12, %c0_23], %49 {strides = array<i32>} : memref<16x64xf32, #tpu.memory_space<vmem>>, vector<2x64xf32>,
    %c4 = arith.constant 4 : index
    %c0_24 = arith.constant 0 : index
    %52 = vector.load %arg5[%c4, %c0_24] : memref<16x256xf32, #tpu.memory_space<vmem>>, vector<2x256xf32>
    %cst_25 = arith.constant dense<0.000000e+00> : vector<2x256xf32>
    %53 = tpu.matmul %49, %9, %cst_25 {dimension_numbers = #tpu.dot_dimension_numbers<[1], [0], [0], [1], [0, 0, 1, 1], [], []>} : vector<2x64xf32>, vector<64x256xf32>, vector<2x256xf32> -> vector<2x256xf32>
    %54 = arith.addf %52, %53 : vector<2x256xf32>
    %55 = vector.extract_strided_slice %54 {offsets = [0, 0], sizes = [2, 192], strides = [1, 1]} : vector<2x256xf32> to vector<2x192xf32>
    %56 = arith.negf %55 : vector<2x192xf32>
    %57 = math.exp %56 : vector<2x192xf32>
    %cst_26 = arith.constant 1.000000e+00 : f32
    %58 = vector.broadcast %cst_26 : f32 to vector<2x192xf32>
    %59 = arith.addf %58, %57 : vector<2x192xf32>
    %60 = arith.divf %58, %59 : vector<2x192xf32>
    %61 = vector.extract_strided_slice %60 {offsets = [0, 0], sizes = [2, 64], strides = [1, 1]} : vector<2x192xf32> to vector<2x64xf32>
    %62 = vector.extract_strided_slice %60 {offsets = [0, 64], sizes = [2, 64], strides = [1, 1]} : vector<2x192xf32> to vector<2x64xf32>
    %63 = vector.extract_strided_slice %60 {offsets = [0, 128], sizes = [2, 64], strides = [1, 1]} : vector<2x192xf32> to vector<2x64xf32>
    %64 = vector.extract_strided_slice %54 {offsets = [0, 192], sizes = [2, 64], strides = [1, 1]} : vector<2x256xf32> to vector<2x64xf32>
    %65 = math.tanh %64 : vector<2x64xf32>
    %66 = arith.mulf %62, %47 : vector<2x64xf32>
    %67 = arith.mulf %61, %65 : vector<2x64xf32>
    %68 = arith.addf %66, %67 : vector<2x64xf32>
    %69 = math.tanh %68 : vector<2x64xf32>
    %70 = arith.mulf %63, %69 : vector<2x64xf32>
    %c4_27 = arith.constant 4 : index
    %c0_28 = arith.constant 0 : index
    %71 = vector.load %arg6[%c4_27, %c0_28] : memref<16x64xf32, #tpu.memory_space<vmem>>, vector<2x64xf32>
    tpu.vector_store %arg6[%c4_27, %c0_28], %70 {strides = array<i32>} : memref<16x64xf32, #tpu.memory_space<vmem>>, vector<2x64xf32>,
    %c10 = arith.constant 10 : index
    %c0_29 = arith.constant 0 : index
    %72 = vector.load %arg7[%c10, %c0_29] : memref<16x64xf32, #tpu.memory_space<vmem>>, vector<2x64xf32>
    tpu.vector_store %arg7[%c10, %c0_29], %70 {strides = array<i32>} : memref<16x64xf32, #tpu.memory_space<vmem>>, vector<2x64xf32>,
    %c6 = arith.constant 6 : index
    %c0_30 = arith.constant 0 : index
    %73 = vector.load %arg5[%c6, %c0_30] : memref<16x256xf32, #tpu.memory_space<vmem>>, vector<2x256xf32>
    %cst_31 = arith.constant dense<0.000000e+00> : vector<2x256xf32>
    %74 = tpu.matmul %70, %9, %cst_31 {dimension_numbers = #tpu.dot_dimension_numbers<[1], [0], [0], [1], [0, 0, 1, 1], [], []>} : vector<2x64xf32>, vector<64x256xf32>, vector<2x256xf32> -> vector<2x256xf32>
    %75 = arith.addf %73, %74 : vector<2x256xf32>
    %76 = vector.extract_strided_slice %75 {offsets = [0, 0], sizes = [2, 192], strides = [1, 1]} : vector<2x256xf32> to vector<2x192xf32>
    %77 = arith.negf %76 : vector<2x192xf32>
    %78 = math.exp %77 : vector<2x192xf32>
    %cst_32 = arith.constant 1.000000e+00 : f32
    %79 = vector.broadcast %cst_32 : f32 to vector<2x192xf32>
    %80 = arith.addf %79, %78 : vector<2x192xf32>
    %81 = arith.divf %79, %80 : vector<2x192xf32>
    %82 = vector.extract_strided_slice %81 {offsets = [0, 0], sizes = [2, 64], strides = [1, 1]} : vector<2x192xf32> to vector<2x64xf32>
    %83 = vector.extract_strided_slice %81 {offsets = [0, 64], sizes = [2, 64], strides = [1, 1]} : vector<2x192xf32> to vector<2x64xf32>
    %84 = vector.extract_strided_slice %81 {offsets = [0, 128], sizes = [2, 64], strides = [1, 1]} : vector<2x192xf32> to vector<2x64xf32>
    %85 = vector.extract_strided_slice %75 {offsets = [0, 192], sizes = [2, 64], strides = [1, 1]} : vector<2x256xf32> to vector<2x64xf32>
    %86 = math.tanh %85 : vector<2x64xf32>
    %87 = arith.mulf %83, %68 : vector<2x64xf32>
    %88 = arith.mulf %82, %86 : vector<2x64xf32>
    %89 = arith.addf %87, %88 : vector<2x64xf32>
    %90 = math.tanh %89 : vector<2x64xf32>
    %91 = arith.mulf %84, %90 : vector<2x64xf32>
    %c6_33 = arith.constant 6 : index
    %c0_34 = arith.constant 0 : index
    %92 = vector.load %arg6[%c6_33, %c0_34] : memref<16x64xf32, #tpu.memory_space<vmem>>, vector<2x64xf32>
    tpu.vector_store %arg6[%c6_33, %c0_34], %91 {strides = array<i32>} : memref<16x64xf32, #tpu.memory_space<vmem>>, vector<2x64xf32>,
    %c8 = arith.constant 8 : index
    %c0_35 = arith.constant 0 : index
    %93 = vector.load %arg7[%c8, %c0_35] : memref<16x64xf32, #tpu.memory_space<vmem>>, vector<2x64xf32>
    tpu.vector_store %arg7[%c8, %c0_35], %91 {strides = array<i32>} : memref<16x64xf32, #tpu.memory_space<vmem>>, vector<2x64xf32>,
    %c8_36 = arith.constant 8 : index
    %c0_37 = arith.constant 0 : index
    %94 = vector.load %arg5[%c8_36, %c0_37] : memref<16x256xf32, #tpu.memory_space<vmem>>, vector<2x256xf32>
    %cst_38 = arith.constant dense<0.000000e+00> : vector<2x256xf32>
    %95 = tpu.matmul %91, %9, %cst_38 {dimension_numbers = #tpu.dot_dimension_numbers<[1], [0], [0], [1], [0, 0, 1, 1], [], []>} : vector<2x64xf32>, vector<64x256xf32>, vector<2x256xf32> -> vector<2x256xf32>
    %96 = arith.addf %94, %95 : vector<2x256xf32>
    %97 = vector.extract_strided_slice %96 {offsets = [0, 0], sizes = [2, 192], strides = [1, 1]} : vector<2x256xf32> to vector<2x192xf32>
    %98 = arith.negf %97 : vector<2x192xf32>
    %99 = math.exp %98 : vector<2x192xf32>
    %cst_39 = arith.constant 1.000000e+00 : f32
    %100 = vector.broadcast %cst_39 : f32 to vector<2x192xf32>
    %101 = arith.addf %100, %99 : vector<2x192xf32>
    %102 = arith.divf %100, %101 : vector<2x192xf32>
    %103 = vector.extract_strided_slice %102 {offsets = [0, 0], sizes = [2, 64], strides = [1, 1]} : vector<2x192xf32> to vector<2x64xf32>
    %104 = vector.extract_strided_slice %102 {offsets = [0, 64], sizes = [2, 64], strides = [1, 1]} : vector<2x192xf32> to vector<2x64xf32>
    %105 = vector.extract_strided_slice %102 {offsets = [0, 128], sizes = [2, 64], strides = [1, 1]} : vector<2x192xf32> to vector<2x64xf32>
    %106 = vector.extract_strided_slice %96 {offsets = [0, 192], sizes = [2, 64], strides = [1, 1]} : vector<2x256xf32> to vector<2x64xf32>
    %107 = math.tanh %106 : vector<2x64xf32>
    %108 = arith.mulf %104, %89 : vector<2x64xf32>
    %109 = arith.mulf %103, %107 : vector<2x64xf32>
    %110 = arith.addf %108, %109 : vector<2x64xf32>
    %111 = math.tanh %110 : vector<2x64xf32>
    %112 = arith.mulf %105, %111 : vector<2x64xf32>
    %c8_40 = arith.constant 8 : index
    %c0_41 = arith.constant 0 : index
    %113 = vector.load %arg6[%c8_40, %c0_41] : memref<16x64xf32, #tpu.memory_space<vmem>>, vector<2x64xf32>
    tpu.vector_store %arg6[%c8_40, %c0_41], %112 {strides = array<i32>} : memref<16x64xf32, #tpu.memory_space<vmem>>, vector<2x64xf32>,
    %c6_42 = arith.constant 6 : index
    %c0_43 = arith.constant 0 : index
    %114 = vector.load %arg7[%c6_42, %c0_43] : memref<16x64xf32, #tpu.memory_space<vmem>>, vector<2x64xf32>
    tpu.vector_store %arg7[%c6_42, %c0_43], %112 {strides = array<i32>} : memref<16x64xf32, #tpu.memory_space<vmem>>, vector<2x64xf32>,
    %c10_44 = arith.constant 10 : index
    %c0_45 = arith.constant 0 : index
    %115 = vector.load %arg5[%c10_44, %c0_45] : memref<16x256xf32, #tpu.memory_space<vmem>>, vector<2x256xf32>
    %cst_46 = arith.constant dense<0.000000e+00> : vector<2x256xf32>
    %116 = tpu.matmul %112, %9, %cst_46 {dimension_numbers = #tpu.dot_dimension_numbers<[1], [0], [0], [1], [0, 0, 1, 1], [], []>} : vector<2x64xf32>, vector<64x256xf32>, vector<2x256xf32> -> vector<2x256xf32>
    %117 = arith.addf %115, %116 : vector<2x256xf32>
    %118 = vector.extract_strided_slice %117 {offsets = [0, 0], sizes = [2, 192], strides = [1, 1]} : vector<2x256xf32> to vector<2x192xf32>
    %119 = arith.negf %118 : vector<2x192xf32>
    %120 = math.exp %119 : vector<2x192xf32>
    %cst_47 = arith.constant 1.000000e+00 : f32
    %121 = vector.broadcast %cst_47 : f32 to vector<2x192xf32>
    %122 = arith.addf %121, %120 : vector<2x192xf32>
    %123 = arith.divf %121, %122 : vector<2x192xf32>
    %124 = vector.extract_strided_slice %123 {offsets = [0, 0], sizes = [2, 64], strides = [1, 1]} : vector<2x192xf32> to vector<2x64xf32>
    %125 = vector.extract_strided_slice %123 {offsets = [0, 64], sizes = [2, 64], strides = [1, 1]} : vector<2x192xf32> to vector<2x64xf32>
    %126 = vector.extract_strided_slice %123 {offsets = [0, 128], sizes = [2, 64], strides = [1, 1]} : vector<2x192xf32> to vector<2x64xf32>
    %127 = vector.extract_strided_slice %117 {offsets = [0, 192], sizes = [2, 64], strides = [1, 1]} : vector<2x256xf32> to vector<2x64xf32>
    %128 = math.tanh %127 : vector<2x64xf32>
    %129 = arith.mulf %125, %110 : vector<2x64xf32>
    %130 = arith.mulf %124, %128 : vector<2x64xf32>
    %131 = arith.addf %129, %130 : vector<2x64xf32>
    %132 = math.tanh %131 : vector<2x64xf32>
    %133 = arith.mulf %126, %132 : vector<2x64xf32>
    %c10_48 = arith.constant 10 : index
    %c0_49 = arith.constant 0 : index
    %134 = vector.load %arg6[%c10_48, %c0_49] : memref<16x64xf32, #tpu.memory_space<vmem>>, vector<2x64xf32>
    tpu.vector_store %arg6[%c10_48, %c0_49], %133 {strides = array<i32>} : memref<16x64xf32, #tpu.memory_space<vmem>>, vector<2x64xf32>,
    %c4_50 = arith.constant 4 : index
    %c0_51 = arith.constant 0 : index
    %135 = vector.load %arg7[%c4_50, %c0_51] : memref<16x64xf32, #tpu.memory_space<vmem>>, vector<2x64xf32>
    tpu.vector_store %arg7[%c4_50, %c0_51], %133 {strides = array<i32>} : memref<16x64xf32, #tpu.memory_space<vmem>>, vector<2x64xf32>,
    %c12_52 = arith.constant 12 : index
    %c0_53 = arith.constant 0 : index
    %136 = vector.load %arg5[%c12_52, %c0_53] : memref<16x256xf32, #tpu.memory_space<vmem>>, vector<2x256xf32>
    %cst_54 = arith.constant dense<0.000000e+00> : vector<2x256xf32>
    %137 = tpu.matmul %133, %9, %cst_54 {dimension_numbers = #tpu.dot_dimension_numbers<[1], [0], [0], [1], [0, 0, 1, 1], [], []>} : vector<2x64xf32>, vector<64x256xf32>, vector<2x256xf32> -> vector<2x256xf32>
    %138 = arith.addf %136, %137 : vector<2x256xf32>
    %139 = vector.extract_strided_slice %138 {offsets = [0, 0], sizes = [2, 192], strides = [1, 1]} : vector<2x256xf32> to vector<2x192xf32>
    %140 = arith.negf %139 : vector<2x192xf32>
    %141 = math.exp %140 : vector<2x192xf32>
    %cst_55 = arith.constant 1.000000e+00 : f32
    %142 = vector.broadcast %cst_55 : f32 to vector<2x192xf32>
    %143 = arith.addf %142, %141 : vector<2x192xf32>
    %144 = arith.divf %142, %143 : vector<2x192xf32>
    %145 = vector.extract_strided_slice %144 {offsets = [0, 0], sizes = [2, 64], strides = [1, 1]} : vector<2x192xf32> to vector<2x64xf32>
    %146 = vector.extract_strided_slice %144 {offsets = [0, 64], sizes = [2, 64], strides = [1, 1]} : vector<2x192xf32> to vector<2x64xf32>
    %147 = vector.extract_strided_slice %144 {offsets = [0, 128], sizes = [2, 64], strides = [1, 1]} : vector<2x192xf32> to vector<2x64xf32>
    %148 = vector.extract_strided_slice %138 {offsets = [0, 192], sizes = [2, 64], strides = [1, 1]} : vector<2x256xf32> to vector<2x64xf32>
    %149 = math.tanh %148 : vector<2x64xf32>
    %150 = arith.mulf %146, %131 : vector<2x64xf32>
    %151 = arith.mulf %145, %149 : vector<2x64xf32>
    %152 = arith.addf %150, %151 : vector<2x64xf32>
    %153 = math.tanh %152 : vector<2x64xf32>
    %154 = arith.mulf %147, %153 : vector<2x64xf32>
    %c12_56 = arith.constant 12 : index
    %c0_57 = arith.constant 0 : index
    %155 = vector.load %arg6[%c12_56, %c0_57] : memref<16x64xf32, #tpu.memory_space<vmem>>, vector<2x64xf32>
    tpu.vector_store %arg6[%c12_56, %c0_57], %154 {strides = array<i32>} : memref<16x64xf32, #tpu.memory_space<vmem>>, vector<2x64xf32>,
    %c2_58 = arith.constant 2 : index
    %c0_59 = arith.constant 0 : index
    %156 = vector.load %arg7[%c2_58, %c0_59] : memref<16x64xf32, #tpu.memory_space<vmem>>, vector<2x64xf32>
    tpu.vector_store %arg7[%c2_58, %c0_59], %154 {strides = array<i32>} : memref<16x64xf32, #tpu.memory_space<vmem>>, vector<2x64xf32>,
    %c14_60 = arith.constant 14 : index
    %c0_61 = arith.constant 0 : index
    %157 = vector.load %arg5[%c14_60, %c0_61] : memref<16x256xf32, #tpu.memory_space<vmem>>, vector<2x256xf32>
    %cst_62 = arith.constant dense<0.000000e+00> : vector<2x256xf32>
    %158 = tpu.matmul %154, %9, %cst_62 {dimension_numbers = #tpu.dot_dimension_numbers<[1], [0], [0], [1], [0, 0, 1, 1], [], []>} : vector<2x64xf32>, vector<64x256xf32>, vector<2x256xf32> -> vector<2x256xf32>
    %159 = arith.addf %157, %158 : vector<2x256xf32>
    %160 = vector.extract_strided_slice %159 {offsets = [0, 0], sizes = [2, 192], strides = [1, 1]} : vector<2x256xf32> to vector<2x192xf32>
    %161 = arith.negf %160 : vector<2x192xf32>
    %162 = math.exp %161 : vector<2x192xf32>
    %cst_63 = arith.constant 1.000000e+00 : f32
    %163 = vector.broadcast %cst_63 : f32 to vector<2x192xf32>
    %164 = arith.addf %163, %162 : vector<2x192xf32>
    %165 = arith.divf %163, %164 : vector<2x192xf32>
    %166 = vector.extract_strided_slice %165 {offsets = [0, 0], sizes = [2, 64], strides = [1, 1]} : vector<2x192xf32> to vector<2x64xf32>
    %167 = vector.extract_strided_slice %165 {offsets = [0, 64], sizes = [2, 64], strides = [1, 1]} : vector<2x192xf32> to vector<2x64xf32>
    %168 = vector.extract_strided_slice %165 {offsets = [0, 128], sizes = [2, 64], strides = [1, 1]} : vector<2x192xf32> to vector<2x64xf32>
    %169 = vector.extract_strided_slice %159 {offsets = [0, 192], sizes = [2, 64], strides = [1, 1]} : vector<2x256xf32> to vector<2x64xf32>
    %170 = math.tanh %169 : vector<2x64xf32>
    %171 = arith.mulf %167, %152 : vector<2x64xf32>
    %172 = arith.mulf %166, %170 : vector<2x64xf32>
    %173 = arith.addf %171, %172 : vector<2x64xf32>
    %174 = math.tanh %173 : vector<2x64xf32>
    %175 = arith.mulf %168, %174 : vector<2x64xf32>
    %c14_64 = arith.constant 14 : index
    %c0_65 = arith.constant 0 : index
    %176 = vector.load %arg6[%c14_64, %c0_65] : memref<16x64xf32, #tpu.memory_space<vmem>>, vector<2x64xf32>
    tpu.vector_store %arg6[%c14_64, %c0_65], %175 {strides = array<i32>} : memref<16x64xf32, #tpu.memory_space<vmem>>, vector<2x64xf32>,
    %c0_66 = arith.constant 0 : index
    %c0_67 = arith.constant 0 : index
    %177 = vector.load %arg7[%c0_66, %c0_67] : memref<16x64xf32, #tpu.memory_space<vmem>>, vector<2x64xf32>
    tpu.vector_store %arg7[%c0_66, %c0_67], %175 {strides = array<i32>} : memref<16x64xf32, #tpu.memory_space<vmem>>, vector<2x64xf32>,
    %c128 = arith.constant 128 : index
    %c0_68 = arith.constant 0 : index
    %178 = vector.load %arg1[%c128, %c0_68] : memref<264x256xf32, #tpu.memory_space<vmem>>, vector<128x256xf32>
    %c1 = arith.constant 1 : index
    %c0_69 = arith.constant 0 : index
    %179 = vector.load %arg2[%c1, %c0_69] : memref<3x256xf32, #tpu.memory_space<vmem>>, vector<1x256xf32>
    %c0_70 = arith.constant 0 : index
    %c0_71 = arith.constant 0 : index
    %180 = vector.load %arg6[%c0_70, %c0_71] : memref<16x64xf32, #tpu.memory_space<vmem>>, vector<16x64xf32>
    %c0_72 = arith.constant 0 : index
    %c0_73 = arith.constant 0 : index
    %181 = vector.load %arg7[%c0_72, %c0_73] : memref<16x64xf32, #tpu.memory_space<vmem>>, vector<16x64xf32>
    %182 = tpu.concatenate %180, %181 in 1 : vector<16x64xf32>, vector<16x64xf32> -> vector<16x128xf32>
    %cst_74 = arith.constant dense<0.000000e+00> : vector<16x256xf32>
    %183 = tpu.matmul %182, %178, %cst_74 {dimension_numbers = #tpu.dot_dimension_numbers<[1], [0], [0], [1], [0, 0, 1, 1], [], []>} : vector<16x128xf32>, vector<128x256xf32>, vector<16x256xf32> -> vector<16x256xf32>
    %184 = vector.broadcast %179 : vector<1x256xf32> to vector<16x256xf32>
    %185 = arith.addf %183, %184 : vector<16x256xf32>
    %c0_75 = arith.constant 0 : index
    %c0_76 = arith.constant 0 : index
    %186 = vector.load %arg5[%c0_75, %c0_76] : memref<16x256xf32, #tpu.memory_space<vmem>>, vector<16x256xf32>
    tpu.vector_store %arg5[%c0_75, %c0_76], %185 {strides = array<i32>} : memref<16x256xf32, #tpu.memory_space<vmem>>, vector<16x256xf32>,
    %c64 = arith.constant 64 : index
    %c0_77 = arith.constant 0 : index
    %187 = vector.load %arg1[%c64, %c0_77] : memref<264x256xf32, #tpu.memory_space<vmem>>, vector<64x256xf32>
    %c0_78 = arith.constant 0 : index
    %c0_79 = arith.constant 0 : index
    %188 = vector.load %arg5[%c0_78, %c0_79] : memref<16x256xf32, #tpu.memory_space<vmem>>, vector<2x256xf32>
    %cst_80 = arith.constant dense<0.000000e+00> : vector<2x256xf32>
    %189 = tpu.matmul %175, %187, %cst_80 {dimension_numbers = #tpu.dot_dimension_numbers<[1], [0], [0], [1], [0, 0, 1, 1], [], []>} : vector<2x64xf32>, vector<64x256xf32>, vector<2x256xf32> -> vector<2x256xf32>
    %190 = arith.addf %188, %189 : vector<2x256xf32>
    %191 = vector.extract_strided_slice %190 {offsets = [0, 0], sizes = [2, 192], strides = [1, 1]} : vector<2x256xf32> to vector<2x192xf32>
    %192 = arith.negf %191 : vector<2x192xf32>
    %193 = math.exp %192 : vector<2x192xf32>
    %cst_81 = arith.constant 1.000000e+00 : f32
    %194 = vector.broadcast %cst_81 : f32 to vector<2x192xf32>
    %195 = arith.addf %194, %193 : vector<2x192xf32>
    %196 = arith.divf %194, %195 : vector<2x192xf32>
    %197 = vector.extract_strided_slice %196 {offsets = [0, 0], sizes = [2, 64], strides = [1, 1]} : vector<2x192xf32> to vector<2x64xf32>
    %198 = vector.extract_strided_slice %196 {offsets = [0, 64], sizes = [2, 64], strides = [1, 1]} : vector<2x192xf32> to vector<2x64xf32>
    %199 = vector.extract_strided_slice %196 {offsets = [0, 128], sizes = [2, 64], strides = [1, 1]} : vector<2x192xf32> to vector<2x64xf32>
    %200 = vector.extract_strided_slice %190 {offsets = [0, 192], sizes = [2, 64], strides = [1, 1]} : vector<2x256xf32> to vector<2x64xf32>
    %201 = math.tanh %200 : vector<2x64xf32>
    %202 = arith.mulf %198, %173 : vector<2x64xf32>
    %203 = arith.mulf %197, %201 : vector<2x64xf32>
    %204 = arith.addf %202, %203 : vector<2x64xf32>
    %205 = math.tanh %204 : vector<2x64xf32>
    %206 = arith.mulf %199, %205 : vector<2x64xf32>
    %cst_82 = arith.constant dense<0.000000e+00> : vector<2x128xf32>
    %207 = tpu.matmul %206, %7, %cst_82 {dimension_numbers = #tpu.dot_dimension_numbers<[1], [0], [0], [1], [0, 0, 1, 1], [], []>} : vector<2x64xf32>, vector<64x128xf32>, vector<2x128xf32> -> vector<2x128xf32>
    %208 = vector.extract_strided_slice %207 {offsets = [0, 0], sizes = [2, 1], strides = [1, 1]} : vector<2x128xf32> to vector<2x1xf32>
    %c0_83 = arith.constant 0 : index
    %c0_84 = arith.constant 0 : index
    %209 = vector.load %arg8[%c0_83, %c0_84] : memref<2x8xf32, #tpu.memory_space<vmem>>, vector<2x1xf32>
    tpu.vector_store %arg8[%c0_83, %c0_84], %208 {strides = array<i32>} : memref<2x8xf32, #tpu.memory_space<vmem>>, vector<2x1xf32>,
    %210 = vector.extract_strided_slice %207 {offsets = [0, 1], sizes = [2, 1], strides = [1, 1]} : vector<2x128xf32> to vector<2x1xf32>
    %c0_85 = arith.constant 0 : index
    %c7 = arith.constant 7 : index
    %211 = vector.load %arg9[%c0_85, %c7] : memref<2x8xf32, #tpu.memory_space<vmem>>, vector<2x1xf32>
    tpu.vector_store %arg9[%c0_85, %c7], %210 {strides = array<i32>} : memref<2x8xf32, #tpu.memory_space<vmem>>, vector<2x1xf32>,
    %c2_86 = arith.constant 2 : index
    %c0_87 = arith.constant 0 : index
    %212 = vector.load %arg5[%c2_86, %c0_87] : memref<16x256xf32, #tpu.memory_space<vmem>>, vector<2x256xf32>
    %cst_88 = arith.constant dense<0.000000e+00> : vector<2x256xf32>
    %213 = tpu.matmul %206, %187, %cst_88 {dimension_numbers = #tpu.dot_dimension_numbers<[1], [0], [0], [1], [0, 0, 1, 1], [], []>} : vector<2x64xf32>, vector<64x256xf32>, vector<2x256xf32> -> vector<2x256xf32>
    %214 = arith.addf %212, %213 : vector<2x256xf32>
    %215 = vector.extract_strided_slice %214 {offsets = [0, 0], sizes = [2, 192], strides = [1, 1]} : vector<2x256xf32> to vector<2x192xf32>
    %216 = arith.negf %215 : vector<2x192xf32>
    %217 = math.exp %216 : vector<2x192xf32>
    %cst_89 = arith.constant 1.000000e+00 : f32
    %218 = vector.broadcast %cst_89 : f32 to vector<2x192xf32>
    %219 = arith.addf %218, %217 : vector<2x192xf32>
    %220 = arith.divf %218, %219 : vector<2x192xf32>
    %221 = vector.extract_strided_slice %220 {offsets = [0, 0], sizes = [2, 64], strides = [1, 1]} : vector<2x192xf32> to vector<2x64xf32>
    %222 = vector.extract_strided_slice %220 {offsets = [0, 64], sizes = [2, 64], strides = [1, 1]} : vector<2x192xf32> to vector<2x64xf32>
    %223 = vector.extract_strided_slice %220 {offsets = [0, 128], sizes = [2, 64], strides = [1, 1]} : vector<2x192xf32> to vector<2x64xf32>
    %224 = vector.extract_strided_slice %214 {offsets = [0, 192], sizes = [2, 64], strides = [1, 1]} : vector<2x256xf32> to vector<2x64xf32>
    %225 = math.tanh %224 : vector<2x64xf32>
    %226 = arith.mulf %222, %204 : vector<2x64xf32>
    %227 = arith.mulf %221, %225 : vector<2x64xf32>
    %228 = arith.addf %226, %227 : vector<2x64xf32>
    %229 = math.tanh %228 : vector<2x64xf32>
    %230 = arith.mulf %223, %229 : vector<2x64xf32>
    %cst_90 = arith.constant dense<0.000000e+00> : vector<2x128xf32>
    %231 = tpu.matmul %230, %7, %cst_90 {dimension_numbers = #tpu.dot_dimension_numbers<[1], [0], [0], [1], [0, 0, 1, 1], [], []>} : vector<2x64xf32>, vector<64x128xf32>, vector<2x128xf32> -> vector<2x128xf32>
    %232 = vector.extract_strided_slice %231 {offsets = [0, 0], sizes = [2, 1], strides = [1, 1]} : vector<2x128xf32> to vector<2x1xf32>
    %c0_91 = arith.constant 0 : index
    %c1_92 = arith.constant 1 : index
    %233 = vector.load %arg8[%c0_91, %c1_92] : memref<2x8xf32, #tpu.memory_space<vmem>>, vector<2x1xf32>
    tpu.vector_store %arg8[%c0_91, %c1_92], %232 {strides = array<i32>} : memref<2x8xf32, #tpu.memory_space<vmem>>, vector<2x1xf32>,
    %234 = vector.extract_strided_slice %231 {offsets = [0, 1], sizes = [2, 1], strides = [1, 1]} : vector<2x128xf32> to vector<2x1xf32>
    %c0_93 = arith.constant 0 : index
    %c6_94 = arith.constant 6 : index
    %235 = vector.load %arg9[%c0_93, %c6_94] : memref<2x8xf32, #tpu.memory_space<vmem>>, vector<2x1xf32>
    tpu.vector_store %arg9[%c0_93, %c6_94], %234 {strides = array<i32>} : memref<2x8xf32, #tpu.memory_space<vmem>>, vector<2x1xf32>,
    %c4_95 = arith.constant 4 : index
    %c0_96 = arith.constant 0 : index
    %236 = vector.load %arg5[%c4_95, %c0_96] : memref<16x256xf32, #tpu.memory_space<vmem>>, vector<2x256xf32>
    %cst_97 = arith.constant dense<0.000000e+00> : vector<2x256xf32>
    %237 = tpu.matmul %230, %187, %cst_97 {dimension_numbers = #tpu.dot_dimension_numbers<[1], [0], [0], [1], [0, 0, 1, 1], [], []>} : vector<2x64xf32>, vector<64x256xf32>, vector<2x256xf32> -> vector<2x256xf32>
    %238 = arith.addf %236, %237 : vector<2x256xf32>
    %239 = vector.extract_strided_slice %238 {offsets = [0, 0], sizes = [2, 192], strides = [1, 1]} : vector<2x256xf32> to vector<2x192xf32>
    %240 = arith.negf %239 : vector<2x192xf32>
    %241 = math.exp %240 : vector<2x192xf32>
    %cst_98 = arith.constant 1.000000e+00 : f32
    %242 = vector.broadcast %cst_98 : f32 to vector<2x192xf32>
    %243 = arith.addf %242, %241 : vector<2x192xf32>
    %244 = arith.divf %242, %243 : vector<2x192xf32>
    %245 = vector.extract_strided_slice %244 {offsets = [0, 0], sizes = [2, 64], strides = [1, 1]} : vector<2x192xf32> to vector<2x64xf32>
    %246 = vector.extract_strided_slice %244 {offsets = [0, 64], sizes = [2, 64], strides = [1, 1]} : vector<2x192xf32> to vector<2x64xf32>
    %247 = vector.extract_strided_slice %244 {offsets = [0, 128], sizes = [2, 64], strides = [1, 1]} : vector<2x192xf32> to vector<2x64xf32>
    %248 = vector.extract_strided_slice %238 {offsets = [0, 192], sizes = [2, 64], strides = [1, 1]} : vector<2x256xf32> to vector<2x64xf32>
    %249 = math.tanh %248 : vector<2x64xf32>
    %250 = arith.mulf %246, %228 : vector<2x64xf32>
    %251 = arith.mulf %245, %249 : vector<2x64xf32>
    %252 = arith.addf %250, %251 : vector<2x64xf32>
    %253 = math.tanh %252 : vector<2x64xf32>
    %254 = arith.mulf %247, %253 : vector<2x64xf32>
    %cst_99 = arith.constant dense<0.000000e+00> : vector<2x128xf32>
    %255 = tpu.matmul %254, %7, %cst_99 {dimension_numbers = #tpu.dot_dimension_numbers<[1], [0], [0], [1], [0, 0, 1, 1], [], []>} : vector<2x64xf32>, vector<64x128xf32>, vector<2x128xf32> -> vector<2x128xf32>
    %256 = vector.extract_strided_slice %255 {offsets = [0, 0], sizes = [2, 1], strides = [1, 1]} : vector<2x128xf32> to vector<2x1xf32>
    %c0_100 = arith.constant 0 : index
    %c2_101 = arith.constant 2 : index
    %257 = vector.load %arg8[%c0_100, %c2_101] : memref<2x8xf32, #tpu.memory_space<vmem>>, vector<2x1xf32>
    tpu.vector_store %arg8[%c0_100, %c2_101], %256 {strides = array<i32>} : memref<2x8xf32, #tpu.memory_space<vmem>>, vector<2x1xf32>,
    %258 = vector.extract_strided_slice %255 {offsets = [0, 1], sizes = [2, 1], strides = [1, 1]} : vector<2x128xf32> to vector<2x1xf32>
    %c0_102 = arith.constant 0 : index
    %c5 = arith.constant 5 : index
    %259 = vector.load %arg9[%c0_102, %c5] : memref<2x8xf32, #tpu.memory_space<vmem>>, vector<2x1xf32>
    tpu.vector_store %arg9[%c0_102, %c5], %258 {strides = array<i32>} : memref<2x8xf32, #tpu.memory_space<vmem>>, vector<2x1xf32>,
    %c6_103 = arith.constant 6 : index
    %c0_104 = arith.constant 0 : index
    %260 = vector.load %arg5[%c6_103, %c0_104] : memref<16x256xf32, #tpu.memory_space<vmem>>, vector<2x256xf32>
    %cst_105 = arith.constant dense<0.000000e+00> : vector<2x256xf32>
    %261 = tpu.matmul %254, %187, %cst_105 {dimension_numbers = #tpu.dot_dimension_numbers<[1], [0], [0], [1], [0, 0, 1, 1], [], []>} : vector<2x64xf32>, vector<64x256xf32>, vector<2x256xf32> -> vector<2x256xf32>
    %262 = arith.addf %260, %261 : vector<2x256xf32>
    %263 = vector.extract_strided_slice %262 {offsets = [0, 0], sizes = [2, 192], strides = [1, 1]} : vector<2x256xf32> to vector<2x192xf32>
    %264 = arith.negf %263 : vector<2x192xf32>
    %265 = math.exp %264 : vector<2x192xf32>
    %cst_106 = arith.constant 1.000000e+00 : f32
    %266 = vector.broadcast %cst_106 : f32 to vector<2x192xf32>
    %267 = arith.addf %266, %265 : vector<2x192xf32>
    %268 = arith.divf %266, %267 : vector<2x192xf32>
    %269 = vector.extract_strided_slice %268 {offsets = [0, 0], sizes = [2, 64], strides = [1, 1]} : vector<2x192xf32> to vector<2x64xf32>
    %270 = vector.extract_strided_slice %268 {offsets = [0, 64], sizes = [2, 64], strides = [1, 1]} : vector<2x192xf32> to vector<2x64xf32>
    %271 = vector.extract_strided_slice %268 {offsets = [0, 128], sizes = [2, 64], strides = [1, 1]} : vector<2x192xf32> to vector<2x64xf32>
    %272 = vector.extract_strided_slice %262 {offsets = [0, 192], sizes = [2, 64], strides = [1, 1]} : vector<2x256xf32> to vector<2x64xf32>
    %273 = math.tanh %272 : vector<2x64xf32>
    %274 = arith.mulf %270, %252 : vector<2x64xf32>
    %275 = arith.mulf %269, %273 : vector<2x64xf32>
    %276 = arith.addf %274, %275 : vector<2x64xf32>
    %277 = math.tanh %276 : vector<2x64xf32>
    %278 = arith.mulf %271, %277 : vector<2x64xf32>
    %cst_107 = arith.constant dense<0.000000e+00> : vector<2x128xf32>
    %279 = tpu.matmul %278, %7, %cst_107 {dimension_numbers = #tpu.dot_dimension_numbers<[1], [0], [0], [1], [0, 0, 1, 1], [], []>} : vector<2x64xf32>, vector<64x128xf32>, vector<2x128xf32> -> vector<2x128xf32>
    %280 = vector.extract_strided_slice %279 {offsets = [0, 0], sizes = [2, 1], strides = [1, 1]} : vector<2x128xf32> to vector<2x1xf32>
    %c0_108 = arith.constant 0 : index
    %c3 = arith.constant 3 : index
    %281 = vector.load %arg8[%c0_108, %c3] : memref<2x8xf32, #tpu.memory_space<vmem>>, vector<2x1xf32>
    tpu.vector_store %arg8[%c0_108, %c3], %280 {strides = array<i32>} : memref<2x8xf32, #tpu.memory_space<vmem>>, vector<2x1xf32>,
    %282 = vector.extract_strided_slice %279 {offsets = [0, 1], sizes = [2, 1], strides = [1, 1]} : vector<2x128xf32> to vector<2x1xf32>
    %c0_109 = arith.constant 0 : index
    %c4_110 = arith.constant 4 : index
    %283 = vector.load %arg9[%c0_109, %c4_110] : memref<2x8xf32, #tpu.memory_space<vmem>>, vector<2x1xf32>
    tpu.vector_store %arg9[%c0_109, %c4_110], %282 {strides = array<i32>} : memref<2x8xf32, #tpu.memory_space<vmem>>, vector<2x1xf32>,
    %c8_111 = arith.constant 8 : index
    %c0_112 = arith.constant 0 : index
    %284 = vector.load %arg5[%c8_111, %c0_112] : memref<16x256xf32, #tpu.memory_space<vmem>>, vector<2x256xf32>
    %cst_113 = arith.constant dense<0.000000e+00> : vector<2x256xf32>
    %285 = tpu.matmul %278, %187, %cst_113 {dimension_numbers = #tpu.dot_dimension_numbers<[1], [0], [0], [1], [0, 0, 1, 1], [], []>} : vector<2x64xf32>, vector<64x256xf32>, vector<2x256xf32> -> vector<2x256xf32>
    %286 = arith.addf %284, %285 : vector<2x256xf32>
    %287 = vector.extract_strided_slice %286 {offsets = [0, 0], sizes = [2, 192], strides = [1, 1]} : vector<2x256xf32> to vector<2x192xf32>
    %288 = arith.negf %287 : vector<2x192xf32>
    %289 = math.exp %288 : vector<2x192xf32>
    %cst_114 = arith.constant 1.000000e+00 : f32
    %290 = vector.broadcast %cst_114 : f32 to vector<2x192xf32>
    %291 = arith.addf %290, %289 : vector<2x192xf32>
    %292 = arith.divf %290, %291 : vector<2x192xf32>
    %293 = vector.extract_strided_slice %292 {offsets = [0, 0], sizes = [2, 64], strides = [1, 1]} : vector<2x192xf32> to vector<2x64xf32>
    %294 = vector.extract_strided_slice %292 {offsets = [0, 64], sizes = [2, 64], strides = [1, 1]} : vector<2x192xf32> to vector<2x64xf32>
    %295 = vector.extract_strided_slice %292 {offsets = [0, 128], sizes = [2, 64], strides = [1, 1]} : vector<2x192xf32> to vector<2x64xf32>
    %296 = vector.extract_strided_slice %286 {offsets = [0, 192], sizes = [2, 64], strides = [1, 1]} : vector<2x256xf32> to vector<2x64xf32>
    %297 = math.tanh %296 : vector<2x64xf32>
    %298 = arith.mulf %294, %276 : vector<2x64xf32>
    %299 = arith.mulf %293, %297 : vector<2x64xf32>
    %300 = arith.addf %298, %299 : vector<2x64xf32>
    %301 = math.tanh %300 : vector<2x64xf32>
    %302 = arith.mulf %295, %301 : vector<2x64xf32>
    %cst_115 = arith.constant dense<0.000000e+00> : vector<2x128xf32>
    %303 = tpu.matmul %302, %7, %cst_115 {dimension_numbers = #tpu.dot_dimension_numbers<[1], [0], [0], [1], [0, 0, 1, 1], [], []>} : vector<2x64xf32>, vector<64x128xf32>, vector<2x128xf32> -> vector<2x128xf32>
    %304 = vector.extract_strided_slice %303 {offsets = [0, 0], sizes = [2, 1], strides = [1, 1]} : vector<2x128xf32> to vector<2x1xf32>
    %c0_116 = arith.constant 0 : index
    %c4_117 = arith.constant 4 : index
    %305 = vector.load %arg8[%c0_116, %c4_117] : memref<2x8xf32, #tpu.memory_space<vmem>>, vector<2x1xf32>
    tpu.vector_store %arg8[%c0_116, %c4_117], %304 {strides = array<i32>} : memref<2x8xf32, #tpu.memory_space<vmem>>, vector<2x1xf32>,
    %306 = vector.extract_strided_slice %303 {offsets = [0, 1], sizes = [2, 1], strides = [1, 1]} : vector<2x128xf32> to vector<2x1xf32>
    %c0_118 = arith.constant 0 : index
    %c3_119 = arith.constant 3 : index
    %307 = vector.load %arg9[%c0_118, %c3_119] : memref<2x8xf32, #tpu.memory_space<vmem>>, vector<2x1xf32>
    tpu.vector_store %arg9[%c0_118, %c3_119], %306 {strides = array<i32>} : memref<2x8xf32, #tpu.memory_space<vmem>>, vector<2x1xf32>,
    %c10_120 = arith.constant 10 : index
    %c0_121 = arith.constant 0 : index
    %308 = vector.load %arg5[%c10_120, %c0_121] : memref<16x256xf32, #tpu.memory_space<vmem>>, vector<2x256xf32>
    %cst_122 = arith.constant dense<0.000000e+00> : vector<2x256xf32>
    %309 = tpu.matmul %302, %187, %cst_122 {dimension_numbers = #tpu.dot_dimension_numbers<[1], [0], [0], [1], [0, 0, 1, 1], [], []>} : vector<2x64xf32>, vector<64x256xf32>, vector<2x256xf32> -> vector<2x256xf32>
    %310 = arith.addf %308, %309 : vector<2x256xf32>
    %311 = vector.extract_strided_slice %310 {offsets = [0, 0], sizes = [2, 192], strides = [1, 1]} : vector<2x256xf32> to vector<2x192xf32>
    %312 = arith.negf %311 : vector<2x192xf32>
    %313 = math.exp %312 : vector<2x192xf32>
    %cst_123 = arith.constant 1.000000e+00 : f32
    %314 = vector.broadcast %cst_123 : f32 to vector<2x192xf32>
    %315 = arith.addf %314, %313 : vector<2x192xf32>
    %316 = arith.divf %314, %315 : vector<2x192xf32>
    %317 = vector.extract_strided_slice %316 {offsets = [0, 0], sizes = [2, 64], strides = [1, 1]} : vector<2x192xf32> to vector<2x64xf32>
    %318 = vector.extract_strided_slice %316 {offsets = [0, 64], sizes = [2, 64], strides = [1, 1]} : vector<2x192xf32> to vector<2x64xf32>
    %319 = vector.extract_strided_slice %316 {offsets = [0, 128], sizes = [2, 64], strides = [1, 1]} : vector<2x192xf32> to vector<2x64xf32>
    %320 = vector.extract_strided_slice %310 {offsets = [0, 192], sizes = [2, 64], strides = [1, 1]} : vector<2x256xf32> to vector<2x64xf32>
    %321 = math.tanh %320 : vector<2x64xf32>
    %322 = arith.mulf %318, %300 : vector<2x64xf32>
    %323 = arith.mulf %317, %321 : vector<2x64xf32>
    %324 = arith.addf %322, %323 : vector<2x64xf32>
    %325 = math.tanh %324 : vector<2x64xf32>
    %326 = arith.mulf %319, %325 : vector<2x64xf32>
    %cst_124 = arith.constant dense<0.000000e+00> : vector<2x128xf32>
    %327 = tpu.matmul %326, %7, %cst_124 {dimension_numbers = #tpu.dot_dimension_numbers<[1], [0], [0], [1], [0, 0, 1, 1], [], []>} : vector<2x64xf32>, vector<64x128xf32>, vector<2x128xf32> -> vector<2x128xf32>
    %328 = vector.extract_strided_slice %327 {offsets = [0, 0], sizes = [2, 1], strides = [1, 1]} : vector<2x128xf32> to vector<2x1xf32>
    %c0_125 = arith.constant 0 : index
    %c5_126 = arith.constant 5 : index
    %329 = vector.load %arg8[%c0_125, %c5_126] : memref<2x8xf32, #tpu.memory_space<vmem>>, vector<2x1xf32>
    tpu.vector_store %arg8[%c0_125, %c5_126], %328 {strides = array<i32>} : memref<2x8xf32, #tpu.memory_space<vmem>>, vector<2x1xf32>,
    %330 = vector.extract_strided_slice %327 {offsets = [0, 1], sizes = [2, 1], strides = [1, 1]} : vector<2x128xf32> to vector<2x1xf32>
    %c0_127 = arith.constant 0 : index
    %c2_128 = arith.constant 2 : index
    %331 = vector.load %arg9[%c0_127, %c2_128] : memref<2x8xf32, #tpu.memory_space<vmem>>, vector<2x1xf32>
    tpu.vector_store %arg9[%c0_127, %c2_128], %330 {strides = array<i32>} : memref<2x8xf32, #tpu.memory_space<vmem>>, vector<2x1xf32>,
    %c12_129 = arith.constant 12 : index
    %c0_130 = arith.constant 0 : index
    %332 = vector.load %arg5[%c12_129, %c0_130] : memref<16x256xf32, #tpu.memory_space<vmem>>, vector<2x256xf32>
    %cst_131 = arith.constant dense<0.000000e+00> : vector<2x256xf32>
    %333 = tpu.matmul %326, %187, %cst_131 {dimension_numbers = #tpu.dot_dimension_numbers<[1], [0], [0], [1], [0, 0, 1, 1], [], []>} : vector<2x64xf32>, vector<64x256xf32>, vector<2x256xf32> -> vector<2x256xf32>
    %334 = arith.addf %332, %333 : vector<2x256xf32>
    %335 = vector.extract_strided_slice %334 {offsets = [0, 0], sizes = [2, 192], strides = [1, 1]} : vector<2x256xf32> to vector<2x192xf32>
    %336 = arith.negf %335 : vector<2x192xf32>
    %337 = math.exp %336 : vector<2x192xf32>
    %cst_132 = arith.constant 1.000000e+00 : f32
    %338 = vector.broadcast %cst_132 : f32 to vector<2x192xf32>
    %339 = arith.addf %338, %337 : vector<2x192xf32>
    %340 = arith.divf %338, %339 : vector<2x192xf32>
    %341 = vector.extract_strided_slice %340 {offsets = [0, 0], sizes = [2, 64], strides = [1, 1]} : vector<2x192xf32> to vector<2x64xf32>
    %342 = vector.extract_strided_slice %340 {offsets = [0, 64], sizes = [2, 64], strides = [1, 1]} : vector<2x192xf32> to vector<2x64xf32>
    %343 = vector.extract_strided_slice %340 {offsets = [0, 128], sizes = [2, 64], strides = [1, 1]} : vector<2x192xf32> to vector<2x64xf32>
    %344 = vector.extract_strided_slice %334 {offsets = [0, 192], sizes = [2, 64], strides = [1, 1]} : vector<2x256xf32> to vector<2x64xf32>
    %345 = math.tanh %344 : vector<2x64xf32>
    %346 = arith.mulf %342, %324 : vector<2x64xf32>
    %347 = arith.mulf %341, %345 : vector<2x64xf32>
    %348 = arith.addf %346, %347 : vector<2x64xf32>
    %349 = math.tanh %348 : vector<2x64xf32>
    %350 = arith.mulf %343, %349 : vector<2x64xf32>
    %cst_133 = arith.constant dense<0.000000e+00> : vector<2x128xf32>
    %351 = tpu.matmul %350, %7, %cst_133 {dimension_numbers = #tpu.dot_dimension_numbers<[1], [0], [0], [1], [0, 0, 1, 1], [], []>} : vector<2x64xf32>, vector<64x128xf32>, vector<2x128xf32> -> vector<2x128xf32>
    %352 = vector.extract_strided_slice %351 {offsets = [0, 0], sizes = [2, 1], strides = [1, 1]} : vector<2x128xf32> to vector<2x1xf32>
    %c0_134 = arith.constant 0 : index
    %c6_135 = arith.constant 6 : index
    %353 = vector.load %arg8[%c0_134, %c6_135] : memref<2x8xf32, #tpu.memory_space<vmem>>, vector<2x1xf32>
    tpu.vector_store %arg8[%c0_134, %c6_135], %352 {strides = array<i32>} : memref<2x8xf32, #tpu.memory_space<vmem>>, vector<2x1xf32>,
    %354 = vector.extract_strided_slice %351 {offsets = [0, 1], sizes = [2, 1], strides = [1, 1]} : vector<2x128xf32> to vector<2x1xf32>
    %c0_136 = arith.constant 0 : index
    %c1_137 = arith.constant 1 : index
    %355 = vector.load %arg9[%c0_136, %c1_137] : memref<2x8xf32, #tpu.memory_space<vmem>>, vector<2x1xf32>
    tpu.vector_store %arg9[%c0_136, %c1_137], %354 {strides = array<i32>} : memref<2x8xf32, #tpu.memory_space<vmem>>, vector<2x1xf32>,
    %c14_138 = arith.constant 14 : index
    %c0_139 = arith.constant 0 : index
    %356 = vector.load %arg5[%c14_138, %c0_139] : memref<16x256xf32, #tpu.memory_space<vmem>>, vector<2x256xf32>
    %cst_140 = arith.constant dense<0.000000e+00> : vector<2x256xf32>
    %357 = tpu.matmul %350, %187, %cst_140 {dimension_numbers = #tpu.dot_dimension_numbers<[1], [0], [0], [1], [0, 0, 1, 1], [], []>} : vector<2x64xf32>, vector<64x256xf32>, vector<2x256xf32> -> vector<2x256xf32>
    %358 = arith.addf %356, %357 : vector<2x256xf32>
    %359 = vector.extract_strided_slice %358 {offsets = [0, 0], sizes = [2, 192], strides = [1, 1]} : vector<2x256xf32> to vector<2x192xf32>
    %360 = arith.negf %359 : vector<2x192xf32>
    %361 = math.exp %360 : vector<2x192xf32>
    %cst_141 = arith.constant 1.000000e+00 : f32
    %362 = vector.broadcast %cst_141 : f32 to vector<2x192xf32>
    %363 = arith.addf %362, %361 : vector<2x192xf32>
    %364 = arith.divf %362, %363 : vector<2x192xf32>
    %365 = vector.extract_strided_slice %364 {offsets = [0, 0], sizes = [2, 64], strides = [1, 1]} : vector<2x192xf32> to vector<2x64xf32>
    %366 = vector.extract_strided_slice %364 {offsets = [0, 64], sizes = [2, 64], strides = [1, 1]} : vector<2x192xf32> to vector<2x64xf32>
    %367 = vector.extract_strided_slice %364 {offsets = [0, 128], sizes = [2, 64], strides = [1, 1]} : vector<2x192xf32> to vector<2x64xf32>
    %368 = vector.extract_strided_slice %358 {offsets = [0, 192], sizes = [2, 64], strides = [1, 1]} : vector<2x256xf32> to vector<2x64xf32>
    %369 = math.tanh %368 : vector<2x64xf32>
    %370 = arith.mulf %366, %348 : vector<2x64xf32>
    %371 = arith.mulf %365, %369 : vector<2x64xf32>
    %372 = arith.addf %370, %371 : vector<2x64xf32>
    %373 = math.tanh %372 : vector<2x64xf32>
    %374 = arith.mulf %367, %373 : vector<2x64xf32>
    %cst_142 = arith.constant dense<0.000000e+00> : vector<2x128xf32>
    %375 = tpu.matmul %374, %7, %cst_142 {dimension_numbers = #tpu.dot_dimension_numbers<[1], [0], [0], [1], [0, 0, 1, 1], [], []>} : vector<2x64xf32>, vector<64x128xf32>, vector<2x128xf32> -> vector<2x128xf32>
    %376 = vector.extract_strided_slice %375 {offsets = [0, 0], sizes = [2, 1], strides = [1, 1]} : vector<2x128xf32> to vector<2x1xf32>
    %c0_143 = arith.constant 0 : index
    %c7_144 = arith.constant 7 : index
    %377 = vector.load %arg8[%c0_143, %c7_144] : memref<2x8xf32, #tpu.memory_space<vmem>>, vector<2x1xf32>
    tpu.vector_store %arg8[%c0_143, %c7_144], %376 {strides = array<i32>} : memref<2x8xf32, #tpu.memory_space<vmem>>, vector<2x1xf32>,
    %378 = vector.extract_strided_slice %375 {offsets = [0, 1], sizes = [2, 1], strides = [1, 1]} : vector<2x128xf32> to vector<2x1xf32>
    %c0_145 = arith.constant 0 : index
    %c0_146 = arith.constant 0 : index
    %379 = vector.load %arg9[%c0_145, %c0_146] : memref<2x8xf32, #tpu.memory_space<vmem>>, vector<2x1xf32>
    tpu.vector_store %arg9[%c0_145, %c0_146], %378 {strides = array<i32>} : memref<2x8xf32, #tpu.memory_space<vmem>>, vector<2x1xf32>,
    %c2_147 = arith.constant 2 : index
    %c0_148 = arith.constant 0 : index
    %380 = vector.load %arg2[%c2_147, %c0_148] : memref<3x256xf32, #tpu.memory_space<vmem>>, vector<1x1xf32>
    %c0_149 = arith.constant 0 : index
    %c0_150 = arith.constant 0 : index
    %381 = vector.load %arg8[%c0_149, %c0_150] : memref<2x8xf32, #tpu.memory_space<vmem>>, vector<2x8xf32>
    %c0_151 = arith.constant 0 : index
    %c0_152 = arith.constant 0 : index
    %382 = vector.load %arg9[%c0_151, %c0_152] : memref<2x8xf32, #tpu.memory_space<vmem>>, vector<2x8xf32>
    %383 = arith.addf %381, %382 : vector<2x8xf32>
    %384 = vector.broadcast %380 : vector<1x1xf32> to vector<2x8xf32>
    %385 = arith.addf %383, %384 : vector<2x8xf32>
    %386 = math.tanh %385 : vector<2x8xf32>
    %c0_153 = arith.constant 0 : index
    %c0_154 = arith.constant 0 : index
    %387 = vector.load %arg4[%c0_153, %c0_154] : memref<2x8xf32, #tpu.memory_space<vmem>>, vector<2x8xf32>
    tpu.vector_store %arg4[%c0_153, %c0_154], %386 {strides = array<i32>} : memref<2x8xf32, #tpu.memory_space<vmem>>, vector<2x8xf32>,
    return
  }
}

</mosaic_0001>

<bundles_post_ra>
// kernel: lstm_double_forward.1
= control target key start
LH: loop header
LB: loop body
LE: loop exit
PB: predicated region body
PF: predicated region fallthrough
CT: control target
= control target key end

     0   :  { %v3739_v7 = vmov 0.0   ;;  %vm34_vm0 = vcmask 64512   ;;  %s4463_s0 = inlined_call_operand.vmem [shape: f32[16,8], index: 0, kind: input, shape index: {}]   ;;  %s4464_s1 = inlined_call_operand.vmem [shape: f32[264,256], index: 1, kind: input, shape index: {}]   ;;  %s4465_s2 = inlined_call_operand.vmem [shape: f32[3,256], index: 2, kind: input, shape index: {}]   ;;  %s4466_s3 = inlined_call_operand.vmem [shape: f32[64,128], index: 3, kind: input, shape index: {}]   ;;  %s4467_s4 = inlined_call_operand.hbm [shape: f32[2,8], index: 4, kind: output, shape index: {}]  }
   0x1   :  { %v131_v0 = vld [vmem:[%s4464_s1 + $0x8] sm:$0xff]  ;;  %v133_v1 = vld [vmem:[%s4464_s1 + $0x18] sm:$0xff]  ;;  %v130_v2 = vld [vmem:[%s4464_s1] sm:$0xff]  ;;  %105 = vmatprep.mubr.f32.mxu0 %v3739_v7  ;;  %216 = vmatprep.mubr.f32.mxu1 %v3739_v7 }
   0x2   :  { %v3786_v3 = vpack.c.bf16 %v133_v1, %v131_v0  ;;  %v132_v4 = vld [vmem:[%s4464_s1 + $0x10] sm:$0xff]  ;;  %v19_v5 = vld [vmem:[%s4464_s1 + $0x208] sm:$0xff]  ;;  %v18_v6 = vld [vmem:[%s4464_s1 + $0x200] sm:$0xff] }
   0x3   :  { %v3799_v8 = vpack.c.bf16 %v132_v4, %v130_v2  ;;  %41 = vmatprep.subr.mxu0 %v19_v5  ;;  %v135_v9 = vld [vmem:[%s4464_s1 + $0x28] sm:$0xff]  ;;  %v137_v10 = vld [vmem:[%s4464_s1 + $0x38] sm:$0xff]  ;;  %v21_v11 = vld [vmem:[%s4463_s0] sm:$0xff] }
   0x4   :  { %3123 = vmatprep.subr.bf16.mxu1 %v3786_v3  ;;  %42 = vmatpush1.msra.mxu0 %v18_v6  ;;  %v3811_v12 = vpack.c.bf16 %v137_v10, %v135_v9  ;;  %v134_v13 = vld [vmem:[%s4464_s1 + $0x20] sm:$0xff]  ;;  %v136_v14 = vld [vmem:[%s4464_s1 + $0x30] sm:$0xff]  ;;  %v139_v15 = vld [vmem:[%s4464_s1 + $0x48] sm:$0xff] }
   0x5   :  { %3125 = vmatpush1.bf16.msra.mxu1 %v3799_v8  ;;  %2840 = vmatmul.mubr.msk.f32.vlgmr.msra.gmra.mrb[0].mxu0 %vm34_vm0, %v21_v11  ;;  %v3824_v16 = vpack.c.bf16 %v136_v14, %v134_v13  ;;  %v141_v17 = vld [vmem:[%s4464_s1 + $0x58] sm:$0xff]  ;;  %v138_v19 = vld [vmem:[%s4464_s1 + $0x40] sm:$0xff]  ;;  %v140_v20 = vld [vmem:[%s4464_s1 + $0x50] sm:$0xff] }
   0x6   :  { %3127 = vmatprep.subr.bf16.mxu1 %v3811_v12  ;;  %v3830_v18 = vpack.c.bf16 %v141_v17, %v139_v15  ;;  %3139 = vmatprep.subr.bf16.mxu0 %v3786_v3  ;;  %v143_v21 = vld [vmem:[%s4464_s1 + $0x68] sm:$0xff]  ;;  %v145_v22 = vld [vmem:[%s4464_s1 + $0x78] sm:$0xff] }
   0x7   :  { %3141 = vmatpush1.bf16.msra.mxu0 %v3799_v8  ;;  %111 = vmatprep.mubr.f32.mxu0 %v3739_v7 }
   0x8   :  { %9 = vsyncpa [#allocation8], 0  ;;  %3143 = vmatprep.subr.bf16.mxu0 %v3811_v12  ;;  %v3849_v23 = vpack.c.bf16 %v140_v20, %v138_v19  ;;  %v3852_v24 = vpack.c.bf16 %v145_v22, %v143_v21  ;;  %v142_v25 = vld [vmem:[%s4464_s1 + $0x60] sm:$0xff]  ;;  %v144_v26 = vld [vmem:[%s4464_s1 + $0x70] sm:$0xff]  ;;  %v24_v28 = vlaneseq  ;;  %s3740_s29 = smov 64   ;;  %vm255_vm1 = vcmask 517120  }
   0x9   :  { %3129 = vmatpush1.bf16.msra.mxu1 %v3824_v16  ;;  %v3863_v27 = vpack.c.bf16 %v144_v26, %v142_v25  ;;  %v20_v31 = vld [vmem:[%s4465_s2] ss:$4 sm:$0x3]  ;;  %v22_v52 = vld [vmem:[%s4463_s0 + $0x8] sm:$0xff]  ;;  %vm148_vm2 = vcmask 523264   ;;  %vm375_vm3 = vcmask 519170  }
   0xa   :  { %3131 = vmatprep.subr.bf16.mxu1 %v3830_v18  ;;  %v3882_v29 = vshrl.u32 %v24_v28, 7  ;;  %2841 = vmatmul.mubr.msk.f32.gmra.mrb[2].mxu0 %vm34_vm0, %v22_v52  ;;  %vm496_vm4 = vcmask 521220   ;;  %vm617_vm5 = vcmask 523270   ;;  %vm3742_vm6 = vmmov 0   ;;  %s3744_s14 = smov 5   ;;  %s3745_s15 = smov 4  }
   0xb   :  { %3145 = vmatpush1.bf16.msra.mxu0 %v3824_v16  ;;  %327 = vmatprep.mubr.f32.mxu0 %v3739_v7  ;;  %vm1434_vm7 = vcmask 1024   ;;  %vm1440_vm8 = vcmask 58424   ;;  %vm1639_vm9 = vcmask 50224   ;;  %vm1838_vm10 = vcmask 42024   ;;  %s3746_s16 = smov 1   ;;  %s3747_s17 = smov 2  }
   0xc   :  { %3147 = vmatprep.subr.bf16.mxu0 %v3830_v18  ;;  %v26_v30 = vsub.s32 0, %v3882_v29  ;;  %v30_v32 = vsub.s32 1, %v3882_v29  ;;  %s3748_s18 = smov 3   ;;  %vm1634_vm11 = vcmask 9224   ;;  %vm1833_vm12 = vcmask 17424   ;;  %s3749_s20 = smov 127  }
   0xd   :  { %3133 = vmatpush1.bf16.msra.mxu1 %v3849_v23  ;;  %vm2032_vm13 = vcmask 25624   ;;  %vm2034_vm14 = vcmask 33824   ;;  %s3750_s21 = smov 7   ;;  %vm2824_vm15 = vcmask 58368  }
   0xe   :  { %3135 = vmatprep.subr.bf16.mxu1 %v3852_v24  ;;  %v27_v33 = vrot.slane %v20_v31, %v26_v30  ;;  %v31_v34 = vrot.slane %v20_v31, %v30_v32 }
   0xf   :  { %3149 = vmatpush1.bf16.msra.mxu0 %v3849_v23 }
  0x10   :  { %3151 = vmatprep.subr.bf16.mxu0 %v3852_v24 }
  0x11   :  { %3137 = vmatpush1.bf16.msra.mxu1 %v3863_v27 }
  0x12   :  { %3155 = vmatprep.subr.bf16.mxu1 %v3786_v3 }
  0x13   :  { %3153 = vmatpush1.bf16.msra.mxu0 %v3863_v27 }
  0x14   :  { %217 = vmatmul.mubr.f32.vlgmr.msra.gmra.mrb[0].mxu1 %v3739_v7  ;;  %3171 = vmatprep.subr.bf16.mxu0 %v3786_v3 }
  0x15   :  { %3157 = vmatpush1.bf16.msra.mxu1 %v3799_v8  ;;  %448 = vmatprep.mubr.f32.mxu1 %v3739_v7 }
  0x16   :  { %3159 = vmatprep.subr.bf16.mxu1 %v3811_v12 }
  0x19   :  { %3161 = vmatpush1.bf16.msra.mxu1 %v3824_v16 }
  0x1a   :  { %3163 = vmatprep.subr.bf16.mxu1 %v3830_v18 }
  0x1d   :  { %3165 = vmatpush1.bf16.msra.mxu1 %v3849_v23 }
  0x1e   :  { %3167 = vmatprep.subr.bf16.mxu1 %v3852_v24 }
  0x21   :  { %3169 = vmatpush1.bf16.msra.mxu1 %v3863_v27 }
  0x22   :  { %3187 = vmatprep.subr.bf16.mxu1 %v3786_v3 }
  0xd8   :  { %v107_v35 = vpop.f32.mrb[0].mxu0 }
  0xd9   :  { %v108_v36 = vadd.f32 %v107_v35, %v27_v33  ;;  %v109_v37 = vpop.f32.mrb[1].mxu0 }
  0xda   :  { %v110_v38 = vadd.f32 %v109_v37, %v31_v34 }
  0xdb   :  { %118 = vst [vmem:[#allocation2] sm:$0xff] %v108_v36 }
  0xdc   :  { %119 = vst [vmem:[#allocation2 + $0x8] sm:$0xff] %v110_v38 }
  0xdd   :  { %v113_v58 = vpop.f32.mrb[2].mxu0 }
  0xde   :  { %v114_v59 = vadd.f32 %v113_v58, %v27_v33  ;;  %v115_v60 = vpop.f32.mrb[3].mxu0 }
  0xdf   :  { %v116_v61 = vadd.f32 %v115_v60, %v31_v34 }
  0xe0   :  { %120 = vst [vmem:[#allocation2 + $0x10] sm:$0xff] %v114_v59 }
  0xe1   :  { %121 = vst [vmem:[#allocation2 + $0x18] sm:$0xff] %v116_v61 }
  0xe2   :  { %v146_v44 = vld [vmem:[#allocation2] sm:$0x3]  ;;  %v258_v14 = vld [vmem:[#allocation2] sm:$0xc] }
  0xe3   :  { %v147_v39 = vld [vmem:[#allocation2 + $0x8] sm:$0x3]  ;;  %v259_v9 = vld [vmem:[#allocation2 + $0x8] sm:$0xc] }
  0xe7   :  { %v218_v40 = vpop.f32.mrb[0].mxu1 }
  0xe8   :  { %v220_v41 = vpop.f32.mrb[1].mxu1  ;;  %v223_v45 = vadd.f32 %v218_v40, %v146_v44 }
  0xe9   :  { %v224_v42 = vadd.f32 %v220_v41, %v147_v39 }
  0xea   :  { %v2842_v46 = vmul.f32 -1.442695, %v223_v45  ;;  %v379_v45 = vld [vmem:[#allocation2 + $0x8] sm:$0x30] }
  0xeb   :  { %3521 = vtanh.f32 %v224_v42  ;;  %v2843_v57 = vmul.f32 -1.442695, %v224_v42 }
  0xec   :  { %3523 = vpow2.f32 %v2842_v46 }
  0xf5   :  { %v3522_v43 = vpop.eup %3521 }
  0xf6   :  { %240 = vrot.lane.b32.xlu0 %v3522_v43, %s3740_s29  ;;  %v3524_v47 = vpop.eup %3523 }
  0xf7   :  { %v231_v48 = vadd.f32 1.0, %v3524_v47 }
  0xf9   :  { %3525 = vrcp.f32 %v231_v48 }
 0x103   :  { %v3526_v49 = vpop.eup %3525 }
 0x104   :  { %v238_v53 = vmul.f32 0.0, %v3526_v49 }
 0x168   :  { %v241_v50 = vpop.permute.xlu0 %240 }
 0x169   :  { %v243_v51 = vmul.f32 %v3526_v49, %v241_v50  ;;  %v378_v49 = vld [vmem:[#allocation2] sm:$0x30] }
 0x16b   :  { %245 = vrot.lane.b32.xlu0 %v243_v51, %s3740_s29 }
 0x1dd   :  { %v246_v54 = vpop.permute.xlu0 %245 }
 0x1de   :  { %v248_v55 = vadd.f32 %v246_v54, %v238_v53 }
 0x1e0   :  { %3527 = vtanh.f32 %v248_v55  ;;  %v356_v26 = vrot.slane %v248_v55, 6 }
 0x1e1   :  { %3529 = vpow2.f32 %v2843_v57 }
 0x1ea   :  { %v3528_v56 = vpop.eup %3527 }
 0x1eb   :  { %251 = vrot.lane.b32.xlu1 %v3528_v56, %s3740_s29  ;;  %v3530_v62 = vpop.eup %3529 }
 0x1ec   :  { %v232_v63 = vadd.f32 1.0, %v3530_v62 }
 0x1ee   :  { %3531 = vrcp.f32 %v232_v63 }
 0x1f8   :  { %v3532_v0 = vpop.eup %3531 }
 0x25d   :  { %v252_v1 = vpop.permute.xlu1 %251 }
 0x25e   :  { %v254_v2 = vmul.f32 %v3532_v0, %v252_v1 }
 0x260   :  { %256 = vst.msk [vmem:[#allocation3] sm:$0x3] %vm255_vm1, %v254_v2  ;;  %257 = vst.msk [vmem:[#allocation4 + $0xe] sm:$0x3] %vm255_vm1, %v254_v2  ;;  %2844 = vmatmul.mubr.msk.f32.vlgmr.msra.gmra.mrb[4].mxu0 %vm148_vm2, %v254_v2 }
 0x261   :  { %3173 = vmatpush1.bf16.msra.mxu0 %v3799_v8  ;;  %569 = vmatprep.mubr.f32.mxu0 %v3739_v7 }
 0x262   :  { %3175 = vmatprep.subr.bf16.mxu0 %v3811_v12 }
 0x265   :  { %3177 = vmatpush1.bf16.msra.mxu0 %v3824_v16 }
 0x266   :  { %3179 = vmatprep.subr.bf16.mxu0 %v3830_v18 }
 0x269   :  { %3181 = vmatpush1.bf16.msra.mxu0 %v3849_v23 }
 0x26a   :  { %3183 = vmatprep.subr.bf16.mxu0 %v3852_v24 }
 0x26d   :  { %3185 = vmatpush1.bf16.msra.mxu0 %v3863_v27 }
 0x26e   :  { %3203 = vmatprep.subr.bf16.mxu0 %v3786_v3 }
 0x333   :  { %v329_v4 = vpop.f32.mrb[4].mxu0 }
 0x334   :  { %v331_v5 = vpop.f32.mrb[5].mxu0  ;;  %v336_v13 = vrot.slane %v329_v4, 6 }
 0x335   :  { %v337_v6 = vrot.slane %v331_v5, 6 }
 0x336   :  { %v340_v15 = vadd.f32 %v336_v13, %v258_v14 }
 0x337   :  { %v341_v10 = vadd.f32 %v337_v6, %v259_v9 }
 0x338   :  { %v2845_v17 = vmul.f32 -1.442695, %v340_v15 }
 0x339   :  { %3533 = vtanh.f32 %v341_v10  ;;  %v2846_v35 = vmul.f32 -1.442695, %v341_v10 }
 0x33a   :  { %3535 = vpow2.f32 %v2845_v17  ;;  %v499_v17 = vld [vmem:[#allocation2] sm:$0xc0] }
 0x343   :  { %v3534_v11 = vpop.eup %3533 }
 0x344   :  { %360 = vrot.lane.b32.xlu1 %v3534_v11, %s3740_s29  ;;  %v3536_v19 = vpop.eup %3535  ;;  %v500_v11 = vld [vmem:[#allocation2 + $0x8] sm:$0xc0] }
 0x345   :  { %v348_v20 = vadd.f32 1.0, %v3536_v19 }
 0x347   :  { %3537 = vrcp.f32 %v348_v20 }
 0x351   :  { %v3538_v21 = vpop.eup %3537 }
 0x352   :  { %v358_v28 = vmul.f32 %v3538_v21, %v356_v26 }
 0x3b6   :  { %v361_v22 = vpop.permute.xlu1 %360 }
 0x3b7   :  { %v363_v25 = vmul.f32 %v3538_v21, %v361_v22 }
 0x3b9   :  { %365 = vrot.lane.b32.xlu0 %v363_v25, %s3740_s29 }
 0x42b   :  { %v366_v31 = vpop.permute.xlu0 %365 }
 0x42c   :  { %v368_v33 = vadd.f32 %v366_v31, %v358_v28 }
 0x42e   :  { %3539 = vtanh.f32 %v368_v33  ;;  %v477_v57 = vrot.slane %v368_v33, 6 }
 0x42f   :  { %3541 = vpow2.f32 %v2846_v35 }
 0x438   :  { %v3540_v34 = vpop.eup %3539 }
 0x439   :  { %371 = vrot.lane.b32.xlu1 %v3540_v34, %s3740_s29  ;;  %v3542_v36 = vpop.eup %3541 }
 0x43a   :  { %v349_v37 = vadd.f32 1.0, %v3542_v36 }
 0x43c   :  { %3543 = vrcp.f32 %v349_v37 }
 0x446   :  { %v3544_v38 = vpop.eup %3543 }
 0x4ab   :  { %v372_v39 = vpop.permute.xlu1 %371 }
 0x4ac   :  { %v374_v40 = vmul.f32 %v3544_v38, %v372_v39 }
 0x4ae   :  { %376 = vst.msk [vmem:[#allocation3] sm:$0xc] %vm375_vm3, %v374_v40  ;;  %377 = vst.msk [vmem:[#allocation4 + $0xa] sm:$0xc] %vm375_vm3, %v374_v40  ;;  %v381_v41 = vrot.slane %v374_v40, 2 }
 0x4b0   :  { %2847 = vmatmul.mubr.msk.f32.vlgmr.msra.gmra.mrb[2].mxu1 %vm148_vm2, %v381_v41 }
 0x4b1   :  { %3189 = vmatpush1.bf16.msra.mxu1 %v3799_v8  ;;  %690 = vmatprep.mubr.f32.mxu1 %v3739_v7 }
 0x4b2   :  { %3191 = vmatprep.subr.bf16.mxu1 %v3811_v12 }
 0x4b5   :  { %3193 = vmatpush1.bf16.msra.mxu1 %v3824_v16 }
 0x4b6   :  { %3195 = vmatprep.subr.bf16.mxu1 %v3830_v18 }
 0x4b9   :  { %3197 = vmatpush1.bf16.msra.mxu1 %v3849_v23 }
 0x4ba   :  { %3199 = vmatprep.subr.bf16.mxu1 %v3852_v24 }
 0x4bd   :  { %3201 = vmatpush1.bf16.msra.mxu1 %v3863_v27 }
 0x4be   :  { %3219 = vmatprep.subr.bf16.mxu1 %v3786_v3 }
 0x583   :  { %v450_v42 = vpop.f32.mrb[2].mxu1 }
 0x584   :  { %v452_v43 = vpop.f32.mrb[3].mxu1  ;;  %v457_v48 = vrot.slane %v450_v42, 4 }
 0x585   :  { %v458_v44 = vrot.slane %v452_v43, 4 }
 0x586   :  { %v461_v50 = vadd.f32 %v457_v48, %v378_v49  ;;  %v620_v48 = vld [vmem:[#allocation2 + $0x10] sm:$0x3] }
 0x587   :  { %v462_v46 = vadd.f32 %v458_v44, %v379_v45  ;;  %v621_v44 = vld [vmem:[#allocation2 + $0x18] sm:$0x3] }
 0x588   :  { %v2848_v51 = vmul.f32 -1.442695, %v461_v50 }
 0x589   :  { %3545 = vtanh.f32 %v462_v46  ;;  %v2849_v62 = vmul.f32 -1.442695, %v462_v46 }
 0x58a   :  { %3547 = vpow2.f32 %v2848_v51 }
 0x593   :  { %v3546_v47 = vpop.eup %3545 }
 0x594   :  { %481 = vrot.lane.b32.xlu0 %v3546_v47, %s3740_s29  ;;  %v3548_v52 = vpop.eup %3547 }
 0x595   :  { %v469_v53 = vadd.f32 1.0, %v3548_v52 }
 0x597   :  { %3549 = vrcp.f32 %v469_v53 }
 0x5a1   :  { %v3550_v54 = vpop.eup %3549 }
 0x5a2   :  { %v479_v58 = vmul.f32 %v3550_v54, %v477_v57 }
 0x606   :  { %v482_v55 = vpop.permute.xlu0 %481 }
 0x607   :  { %v484_v56 = vmul.f32 %v3550_v54, %v482_v55 }
 0x609   :  { %486 = vrot.lane.b32.xlu1 %v484_v56, %s3740_s29 }
 0x67b   :  { %v487_v59 = vpop.permute.xlu1 %486 }
 0x67c   :  { %v489_v60 = vadd.f32 %v487_v59, %v479_v58 }
 0x67e   :  { %3551 = vtanh.f32 %v489_v60  ;;  %v598_v28 = vrot.slane %v489_v60, 6 }
 0x67f   :  { %3553 = vpow2.f32 %v2849_v62 }
 0x688   :  { %v3552_v61 = vpop.eup %3551 }
 0x689   :  { %492 = vrot.lane.b32.xlu0 %v3552_v61, %s3740_s29  ;;  %v3554_v63 = vpop.eup %3553 }
 0x68a   :  { %v470_v0 = vadd.f32 1.0, %v3554_v63 }
 0x68c   :  { %3555 = vrcp.f32 %v470_v0 }
 0x696   :  { %v3556_v1 = vpop.eup %3555 }
 0x6fb   :  { %v493_v2 = vpop.permute.xlu0 %492 }
 0x6fc   :  { %v495_v4 = vmul.f32 %v3556_v1, %v493_v2 }
 0x6fe   :  { %497 = vst.msk [vmem:[#allocation3] sm:$0x30] %vm496_vm4, %v495_v4  ;;  %498 = vst.msk [vmem:[#allocation4 + $0x6] sm:$0x30] %vm496_vm4, %v495_v4  ;;  %v502_v5 = vrot.slane %v495_v4, 4 }
 0x700   :  { %2850 = vmatmul.mubr.msk.f32.vlgmr.msra.gmra.mrb[6].mxu0 %vm148_vm2, %v502_v5 }
 0x701   :  { %3205 = vmatpush1.bf16.msra.mxu0 %v3799_v8  ;;  %803 = vmatprep.mubr.f32.mxu0 %v3739_v7 }
 0x702   :  { %3207 = vmatprep.subr.bf16.mxu0 %v3811_v12 }
 0x705   :  { %3209 = vmatpush1.bf16.msra.mxu0 %v3824_v16 }
 0x706   :  { %3211 = vmatprep.subr.bf16.mxu0 %v3830_v18 }
 0x709   :  { %3213 = vmatpush1.bf16.msra.mxu0 %v3849_v23 }
 0x70a   :  { %3215 = vmatprep.subr.bf16.mxu0 %v3852_v24 }
 0x70d   :  { %3217 = vmatpush1.bf16.msra.mxu0 %v3863_v27 }
 0x70e   :  { %3235 = vmatprep.subr.bf16.mxu0 %v3786_v3 }
 0x7d3   :  { %v571_v6 = vpop.f32.mrb[6].mxu0 }
 0x7d4   :  { %v573_v9 = vpop.f32.mrb[7].mxu0  ;;  %v578_v15 = vrot.slane %v571_v6, 2 }
 0x7d5   :  { %v579_v10 = vrot.slane %v573_v9, 2  ;;  %v735_v9 = vld [vmem:[#allocation2 + $0x18] sm:$0xc] }
 0x7d6   :  { %v582_v19 = vadd.f32 %v578_v15, %v499_v17 }
 0x7d7   :  { %v583_v13 = vadd.f32 %v579_v10, %v500_v11  ;;  %v734_v11 = vld [vmem:[#allocation2 + $0x10] sm:$0xc] }
 0x7d8   :  { %v2851_v20 = vmul.f32 -1.442695, %v582_v19 }
 0x7d9   :  { %3557 = vtanh.f32 %v583_v13  ;;  %v2852_v36 = vmul.f32 -1.442695, %v583_v13 }
 0x7da   :  { %3559 = vpow2.f32 %v2851_v20 }
 0x7e3   :  { %v3558_v14 = vpop.eup %3557 }
 0x7e4   :  { %602 = vrot.lane.b32.xlu1 %v3558_v14, %s3740_s29  ;;  %v3560_v21 = vpop.eup %3559 }
 0x7e5   :  { %v590_v22 = vadd.f32 1.0, %v3560_v21 }
 0x7e7   :  { %3561 = vrcp.f32 %v590_v22 }
 0x7f1   :  { %v3562_v25 = vpop.eup %3561 }
 0x7f2   :  { %v600_v31 = vmul.f32 %v3562_v25, %v598_v28 }
 0x856   :  { %v603_v26 = vpop.permute.xlu1 %602 }
 0x857   :  { %v605_v3 = vmul.f32 %v3562_v25, %v603_v26 }
 0x859   :  { %607 = vrot.lane.b32.xlu0 %v605_v3, %s3740_s29 }
 0x8cb   :  { %v608_v33 = vpop.permute.xlu0 %607 }
 0x8cc   :  { %v610_v34 = vadd.f32 %v608_v33, %v600_v31 }
 0x8ce   :  { %3563 = vtanh.f32 %v610_v34  ;;  %v713_v56 = vrot.slane %v610_v34, 6 }
 0x8cf   :  { %3565 = vpow2.f32 %v2852_v36 }
 0x8d8   :  { %v3564_v35 = vpop.eup %3563 }
 0x8d9   :  { %613 = vrot.lane.b32.xlu1 %v3564_v35, %s3740_s29  ;;  %v3566_v37 = vpop.eup %3565 }
 0x8da   :  { %v591_v38 = vadd.f32 1.0, %v3566_v37  ;;  %v854_v37 = vld [vmem:[#allocation2 + $0x18] sm:$0x30] }
 0x8dc   :  { %3567 = vrcp.f32 %v591_v38 }
 0x8e6   :  { %v3568_v39 = vpop.eup %3567 }
 0x94b   :  { %v614_v40 = vpop.permute.xlu1 %613 }
 0x94c   :  { %v616_v41 = vmul.f32 %v3568_v39, %v614_v40 }
 0x94e   :  { %618 = vst.msk [vmem:[#allocation3] sm:$0xc0] %vm617_vm5, %v616_v41  ;;  %619 = vst.msk [vmem:[#allocation4 + $0x2] sm:$0xc0] %vm617_vm5, %v616_v41  ;;  %v623_v42 = vrot.slane %v616_v41, 6 }
 0x94f   :  { %v853_v41 = vld [vmem:[#allocation2 + $0x10] sm:$0x30] }
 0x950   :  { %2853 = vmatmul.mubr.msk.f32.vlgmr.msra.gmra.mrb[4].mxu1 %vm148_vm2, %v623_v42 }
 0x951   :  { %3221 = vmatpush1.bf16.msra.mxu1 %v3799_v8  ;;  %923 = vmatprep.mubr.f32.mxu1 %v3739_v7 }
 0x952   :  { %3223 = vmatprep.subr.bf16.mxu1 %v3811_v12 }
 0x955   :  { %3225 = vmatpush1.bf16.msra.mxu1 %v3824_v16 }
 0x956   :  { %3227 = vmatprep.subr.bf16.mxu1 %v3830_v18 }
 0x959   :  { %3229 = vmatpush1.bf16.msra.mxu1 %v3849_v23 }
 0x95a   :  { %3231 = vmatprep.subr.bf16.mxu1 %v3852_v24 }
 0x95d   :  { %3233 = vmatpush1.bf16.msra.mxu1 %v3863_v27 }
 0xa23   :  { %v692_v43 = vpop.f32.mrb[4].mxu1 }
 0xa24   :  { %v694_v45 = vpop.f32.mrb[5].mxu1  ;;  %v697_v49 = vadd.f32 %v692_v43, %v620_v48 }
 0xa25   :  { %v698_v46 = vadd.f32 %v694_v45, %v621_v44 }
 0xa26   :  { %v2854_v50 = vmul.f32 -1.442695, %v697_v49 }
 0xa27   :  { %3569 = vtanh.f32 %v698_v46  ;;  %v2855_v61 = vmul.f32 -1.442695, %v698_v46 }
 0xa28   :  { %3571 = vpow2.f32 %v2854_v50 }
 0xa31   :  { %v3570_v47 = vpop.eup %3569 }
 0xa32   :  { %717 = vrot.lane.b32.xlu0 %v3570_v47, %s3740_s29  ;;  %v3572_v51 = vpop.eup %3571 }
 0xa33   :  { %v705_v52 = vadd.f32 1.0, %v3572_v51 }
 0xa35   :  { %3573 = vrcp.f32 %v705_v52 }
 0xa3f   :  { %v3574_v53 = vpop.eup %3573 }
 0xa40   :  { %v715_v57 = vmul.f32 %v3574_v53, %v713_v56 }
 0xaa4   :  { %v718_v54 = vpop.permute.xlu0 %717 }
 0xaa5   :  { %v720_v55 = vmul.f32 %v3574_v53, %v718_v54 }
 0xaa7   :  { %722 = vrot.lane.b32.xlu1 %v720_v55, %s3740_s29 }
 0xb19   :  { %v723_v58 = vpop.permute.xlu1 %722 }
 0xb1a   :  { %v725_v59 = vadd.f32 %v723_v58, %v715_v57 }
 0xb1c   :  { %3575 = vtanh.f32 %v725_v59  ;;  %v832_v15 = vrot.slane %v725_v59, 6 }
 0xb1d   :  { %3577 = vpow2.f32 %v2855_v61 }
 0xb26   :  { %v3576_v60 = vpop.eup %3575 }
 0xb27   :  { %728 = vrot.lane.b32.xlu0 %v3576_v60, %s3740_s29  ;;  %v3578_v62 = vpop.eup %3577 }
 0xb28   :  { %v706_v63 = vadd.f32 1.0, %v3578_v62 }
 0xb2a   :  { %3579 = vrcp.f32 %v706_v63 }
 0xb34   :  { %v3580_v0 = vpop.eup %3579 }
 0xb99   :  { %v729_v1 = vpop.permute.xlu0 %728 }
 0xb9a   :  { %v731_v2 = vmul.f32 %v3580_v0, %v729_v1  ;;  %v974_v0 = vld [vmem:[#allocation2 + $0x18] sm:$0xc0] }
 0xb9c   :  { %732 = vst.msk [vmem:[#allocation3 + $0x8] sm:$0x3] %vm255_vm1, %v731_v2  ;;  %733 = vst.msk [vmem:[#allocation4 + $0x6] sm:$0x3] %vm255_vm1, %v731_v2  ;;  %2856 = vmatmul.mubr.msk.f32.vlgmr.msra.gmra.mrb[8].mxu0 %vm148_vm2, %v731_v2 }
 0xb9d   :  { %3237 = vmatpush1.bf16.msra.mxu0 %v3799_v8  ;;  %1043 = vmatprep.mubr.f32.mxu0 %v3739_v7 }
 0xb9e   :  { %3239 = vmatprep.subr.bf16.mxu0 %v3811_v12 }
 0xba1   :  { %3241 = vmatpush1.bf16.msra.mxu0 %v3824_v16 }
 0xba2   :  { %3243 = vmatprep.subr.bf16.mxu0 %v3830_v18 }
 0xba5   :  { %3245 = vmatpush1.bf16.msra.mxu0 %v3849_v23 }
 0xba6   :  { %3247 = vmatprep.subr.bf16.mxu0 %v3852_v24 }
 0xba9   :  { %3249 = vmatpush1.bf16.msra.mxu0 %v3863_v27 }
 0xc6f   :  { %v805_v4 = vpop.f32.mrb[8].mxu0 }
 0xc70   :  { %v807_v5 = vpop.f32.mrb[9].mxu0  ;;  %v812_v12 = vrot.slane %v805_v4, 6 }
 0xc71   :  { %v813_v6 = vrot.slane %v807_v5, 6  ;;  %v973_v5 = vld [vmem:[#allocation2 + $0x10] sm:$0xc0] }
 0xc72   :  { %v816_v16 = vadd.f32 %v812_v12, %v734_v11 }
 0xc73   :  { %v817_v10 = vadd.f32 %v813_v6, %v735_v9 }
 0xc74   :  { %v2857_v13 = vmul.f32 -1.442695, %v816_v16 }
 0xc75   :  { %3581 = vtanh.f32 %v817_v10  ;;  %v2858_v22 = vmul.f32 -1.442695, %v817_v10 }
 0xc76   :  { %3583 = vpow2.f32 %v2857_v13  ;;  %v1234_v13 = vld [vmem:[%s4464_s1 + $0x88] sm:$0xff] }
 0xc7f   :  { %v3582_v8 = vpop.eup %3581 }
 0xc80   :  { %836 = vrot.lane.b32.xlu1 %v3582_v8, %s3740_s29  ;;  %v3584_v18 = vpop.eup %3583 }
 0xc81   :  { %v824_v23 = vadd.f32 1.0, %v3584_v18  ;;  %v1236_v18 = vld [vmem:[%s4464_s1 + $0x98] sm:$0xff] }
 0xc83   :  { %3585 = vrcp.f32 %v824_v23  ;;  %v1233_v23 = vld [vmem:[%s4464_s1 + $0x80] sm:$0xff] }
 0xc8d   :  { %v3586_v24 = vpop.eup %3585 }
 0xc8e   :  { %v834_v17 = vmul.f32 %v3586_v24, %v832_v15  ;;  %v1240_v15 = vld [vmem:[%s4464_s1 + $0xb8] sm:$0xff] }
 0xcf2   :  { %v837_v14 = vpop.permute.xlu1 %836 }
 0xcf3   :  { %v839_v27 = vmul.f32 %v3586_v24, %v837_v14  ;;  %v4002_v24 = vpack.c.bf16 %v1236_v18, %v1234_v13  ;;  %v1235_v14 = vld [vmem:[%s4464_s1 + $0x90] sm:$0xff]  ;;  %v1116_v13 = vld [vmem:[%s4464_s1 + $0x1b8] sm:$0xff] }
 0xcf5   :  { %841 = vrot.lane.b32.xlu0 %v839_v27, %s3740_s29  ;;  %v1238_v27 = vld [vmem:[%s4464_s1 + $0xa8] sm:$0xff]  ;;  %3283 = vmatprep.subr.bf16.mxu0 %v4002_v24 }
 0xd67   :  { %v842_v19 = vpop.permute.xlu0 %841 }
 0xd68   :  { %v844_v20 = vadd.f32 %v842_v19, %v834_v17  ;;  %v4013_v17 = vpack.c.bf16 %v1235_v14, %v1233_v23  ;;  %v4015_v19 = vpack.c.bf16 %v1240_v15, %v1238_v27  ;;  %v1113_v14 = vld [vmem:[%s4464_s1 + $0x1a0] sm:$0xff]  ;;  %v1115_v27 = vld [vmem:[%s4464_s1 + $0x1b0] sm:$0xff]  ;;  %v1118_v15 = vld [vmem:[%s4464_s1 + $0x1c8] sm:$0xff] }
 0xd6a   :  { %3587 = vtanh.f32 %v844_v20  ;;  %v952_v49 = vrot.slane %v844_v20, 6  ;;  %v1237_v20 = vld [vmem:[%s4464_s1 + $0xa0] sm:$0xff] }
 0xd6b   :  { %3589 = vpow2.f32 %v2858_v22  ;;  %v1242_v22 = vld [vmem:[%s4464_s1 + $0xc8] sm:$0xff] }
 0xd74   :  { %v3588_v21 = vpop.eup %3587 }
 0xd75   :  { %847 = vrot.lane.b32.xlu1 %v3588_v21, %s3740_s29  ;;  %v3590_v25 = vpop.eup %3589  ;;  %v1239_v21 = vld [vmem:[%s4464_s1 + $0xb0] sm:$0xff] }
 0xd76   :  { %v825_v26 = vadd.f32 1.0, %v3590_v25  ;;  %v1244_v25 = vld [vmem:[%s4464_s1 + $0xd8] sm:$0xff] }
 0xd78   :  { %3591 = vrcp.f32 %v825_v26  ;;  %v4031_v26 = vpack.c.bf16 %v1239_v21, %v1237_v20  ;;  %v1120_v20 = vld [vmem:[%s4464_s1 + $0x1d8] sm:$0xff]  ;;  %v3272_v21 = vpack.c.bf16 %v1115_v27, %v1113_v14 }
 0xd79   :  { %v125_v27 = vld [vmem:[%s4466_s3 + $0x18] sm:$0xff] }
 0xd82   :  { %v3592_v3 = vpop.eup %3591 }
 0xde7   :  { %v848_v28 = vpop.permute.xlu1 %847 }
 0xde8   :  { %v850_v31 = vmul.f32 %v3592_v3, %v848_v28  ;;  %v4034_v3 = vpack.c.bf16 %v1244_v25, %v1242_v22  ;;  %v1241_v28 = vld [vmem:[%s4464_s1 + $0xc0] sm:$0xff]  ;;  %v3274_v22 = vpack.c.bf16 %v1120_v20, %v1118_v15 }
 0xde9   :  { %v1117_v25 = vld [vmem:[%s4464_s1 + $0x1c0] sm:$0xff] }
 0xdea   :  { %851 = vst.msk [vmem:[#allocation3 + $0x8] sm:$0xc] %vm375_vm3, %v850_v31  ;;  %852 = vst.msk [vmem:[#allocation4 + $0x2] sm:$0xc] %vm375_vm3, %v850_v31  ;;  %v856_v33 = vrot.slane %v850_v31, 2  ;;  %v1243_v31 = vld [vmem:[%s4464_s1 + $0xd0] sm:$0xff] }
 0xdeb   :  { %v126_v20 = vld [vmem:[%s4466_s3 + $0x20] sm:$0xff] }
 0xdec   :  { %2859 = vmatmul.mubr.msk.f32.vlgmr.msra.gmra.mrb[6].mxu1 %vm148_vm2, %v856_v33  ;;  %v4043_v33 = vpack.c.bf16 %v1243_v31, %v1241_v28  ;;  %v1119_v28 = vld [vmem:[%s4464_s1 + $0x1d0] sm:$0xff]  ;;  %v1122_v31 = vld [vmem:[%s4464_s1 + $0x1e8] sm:$0xff] }
 0xded   :  { %1216 = vmatprep.mubr.f32.mxu1 %v3739_v7 }
 0xebf   :  { %v925_v34 = vpop.f32.mrb[6].mxu1 }
 0xec0   :  { %v927_v35 = vpop.f32.mrb[7].mxu1  ;;  %v932_v40 = vrot.slane %v925_v34, 4 }
 0xec1   :  { %v933_v36 = vrot.slane %v927_v35, 4  ;;  %v1246_v35 = vld [vmem:[%s4464_s1 + $0xe8] sm:$0xff] }
 0xec2   :  { %v936_v42 = vadd.f32 %v932_v40, %v853_v41  ;;  %v1247_v40 = vld [vmem:[%s4464_s1 + $0xf0] sm:$0xff] }
 0xec3   :  { %v937_v38 = vadd.f32 %v933_v36, %v854_v37  ;;  %v1248_v36 = vld [vmem:[%s4464_s1 + $0xf8] sm:$0xff] }
 0xec4   :  { %v2860_v43 = vmul.f32 -1.442695, %v936_v42 }
 0xec5   :  { %3593 = vtanh.f32 %v937_v38  ;;  %v2861_v54 = vmul.f32 -1.442695, %v937_v38  ;;  %v4054_v38 = vpack.c.bf16 %v1248_v36, %v1246_v35  ;;  %v3276_v35 = vpack.c.bf16 %v1119_v28, %v1117_v25  ;;  %v128_v25 = vld [vmem:[%s4466_s3 + $0x30] sm:$0xff]  ;;  %v129_v28 = vld [vmem:[%s4466_s3 + $0x38] sm:$0xff] }
 0xec6   :  { %3595 = vpow2.f32 %v2860_v43 }
 0xecf   :  { %v3594_v39 = vpop.eup %3593 }
 0xed0   :  { %956 = vrot.lane.b32.xlu0 %v3594_v39, %s3740_s29  ;;  %v3596_v44 = vpop.eup %3595  ;;  %v1245_v39 = vld [vmem:[%s4464_s1 + $0xe0] sm:$0xff] }
 0xed1   :  { %v944_v45 = vadd.f32 1.0, %v3596_v44  ;;  %v4062_v42 = vpack.c.bf16 %v1247_v40, %v1245_v39  ;;  %v1094_v44 = vld [vmem:[%s4464_s1 + $0x108] sm:$0xff]  ;;  %v1123_v39 = vld [vmem:[%s4464_s1 + $0x1f0] sm:$0xff] }
 0xed3   :  { %3597 = vrcp.f32 %v944_v45  ;;  %v1096_v45 = vld [vmem:[%s4464_s1 + $0x118] sm:$0xff] }
 0xedd   :  { %v3598_v46 = vpop.eup %3597 }
 0xede   :  { %v954_v50 = vmul.f32 %v3598_v46, %v952_v49  ;;  %v1098_v49 = vld [vmem:[%s4464_s1 + $0x128] sm:$0xff] }
 0xf42   :  { %v957_v47 = vpop.permute.xlu0 %956 }
 0xf43   :  { %v959_v48 = vmul.f32 %v3598_v46, %v957_v47  ;;  %v1093_v46 = vld [vmem:[%s4464_s1 + $0x100] sm:$0xff]  ;;  %v3250_v47 = vpack.c.bf16 %v1096_v45, %v1094_v44 }
 0xf45   :  { %961 = vrot.lane.b32.xlu1 %v959_v48, %s3740_s29  ;;  %v1095_v48 = vld [vmem:[%s4464_s1 + $0x110] sm:$0xff]  ;;  %3251 = vmatprep.subr.bf16.mxu1 %v3250_v47 }
 0xfb7   :  { %v962_v51 = vpop.permute.xlu1 %961 }
 0xfb8   :  { %v3980_v52 = vadd.f32 %v962_v51, %v954_v50  ;;  %v1100_v50 = vld [vmem:[%s4464_s1 + $0x138] sm:$0xff] }
 0xfba   :  { %3599 = vtanh.f32 %v3980_v52  ;;  %v1072_v34 = vrot.slane %v3980_v52, 6  ;;  %v3252_v52 = vpack.c.bf16 %v1095_v48, %v1093_v46 }
 0xfbb   :  { %3601 = vpow2.f32 %v2861_v54  ;;  %v1097_v54 = vld [vmem:[%s4464_s1 + $0x120] sm:$0xff] }
 0xfbc   :  { %3253 = vmatpush1.bf16.msra.mxu1 %v3252_v52  ;;  %v1127_v52 = vld [vmem:[#allocation3] sm:$0xff] }
 0xfc4   :  { %v3600_v53 = vpop.eup %3599 }
 0xfc5   :  { %967 = vrot.lane.b32.xlu0 %v3600_v53, %s3740_s29  ;;  %v3602_v55 = vpop.eup %3601  ;;  %v3254_v53 = vpack.c.bf16 %v1100_v50, %v1098_v49 }
 0xfc6   :  { %v945_v56 = vadd.f32 1.0, %v3602_v55  ;;  %v1099_v55 = vld [vmem:[%s4464_s1 + $0x130] sm:$0xff] }
 0xfc7   :  { %3255 = vmatprep.subr.bf16.mxu1 %v3254_v53 }
 0xfc8   :  { %3603 = vrcp.f32 %v945_v56  ;;  %v1102_v56 = vld [vmem:[%s4464_s1 + $0x148] sm:$0xff] }
 0xfd2   :  { %v3604_v57 = vpop.eup %3603 }
0x1037   :  { %v968_v58 = vpop.permute.xlu0 %967 }
0x1038   :  { %v970_v59 = vmul.f32 %v3604_v57, %v968_v58  ;;  %v1104_v57 = vld [vmem:[%s4464_s1 + $0x158] sm:$0xff]  ;;  %v3256_v58 = vpack.c.bf16 %v1099_v55, %v1097_v54  ;;  %v2865_v55 = vld [vmem:[%s4465_s2 + $0x1] ss:$4 sm:$0x3] }
0x103a   :  { %971 = vst.msk [vmem:[#allocation3 + $0x8] sm:$0x30] %vm496_vm4, %v970_v59  ;;  %972 = vst.msk [vmem:[#allocation4 - $0x2] sm:$0x30] %vm496_vm4, %v970_v59  ;;  %v976_v60 = vrot.slane %v970_v59, 4  ;;  %v3258_v59 = vpack.c.bf16 %v1104_v57, %v1102_v56  ;;  %3257 = vmatpush1.bf16.msra.mxu1 %v3256_v58  ;;  %v4187_v56 = vrot.slane %v2865_v55, %v26_v30  ;;  %v1130_v30 = vld [vmem:[#allocation4 + $0x8] sm:$0xff] }
0x103b   :  { %v4191_v57 = vrot.slane %v2865_v55, %v30_v32 }
0x103c   :  { %2862 = vmatmul.mubr.msk.f32.vlgmr.msra.gmra.mrb[10].mxu0 %vm148_vm2, %v976_v60  ;;  %v1101_v60 = vld [vmem:[%s4464_s1 + $0x140] sm:$0xff]  ;;  %3259 = vmatprep.subr.bf16.mxu1 %v3258_v59 }
0x103d   :  { %1319 = vmatprep.mubr.f32.mxu0 %v3739_v7  ;;  %3285 = vmatpush1.bf16.msra.mxu0 %v4013_v17 }
0x103e   :  { %3287 = vmatprep.subr.bf16.mxu0 %v4015_v19 }
0x1041   :  { %3289 = vmatpush1.bf16.msra.mxu0 %v4031_v26 }
0x1042   :  { %3291 = vmatprep.subr.bf16.mxu0 %v4034_v3 }
0x1045   :  { %3293 = vmatpush1.bf16.msra.mxu0 %v4043_v33 }
0x1046   :  { %3295 = vmatprep.subr.bf16.mxu0 %v4054_v38 }
0x1049   :  { %3297 = vmatpush1.bf16.msra.mxu0 %v4062_v42 }
0x110f   :  { %v1045_v61 = vpop.f32.mrb[10].mxu0 }
0x1110   :  { %v1047_v62 = vpop.f32.mrb[11].mxu0  ;;  %v1052_v4 = vrot.slane %v1045_v61, 2  ;;  %v1103_v61 = vld [vmem:[%s4464_s1 + $0x150] sm:$0xff] }
0x1111   :  { %v1053_v63 = vrot.slane %v1047_v62, 2  ;;  %v1106_v62 = vld [vmem:[%s4464_s1 + $0x168] sm:$0xff] }
0x1112   :  { %v1056_v6 = vadd.f32 %v1052_v4, %v973_v5  ;;  %v1105_v4 = vld [vmem:[%s4464_s1 + $0x160] sm:$0xff]  ;;  %v1107_v5 = vld [vmem:[%s4464_s1 + $0x170] sm:$0xff] }
0x1113   :  { %v3988_v1 = vadd.f32 %v1053_v63, %v974_v0  ;;  %v1108_v63 = vld [vmem:[%s4464_s1 + $0x178] sm:$0xff]  ;;  %v3260_v0 = vpack.c.bf16 %v1103_v61, %v1101_v60 }
0x1114   :  { %v2863_v9 = vmul.f32 -1.442695, %v1056_v6  ;;  %v1110_v6 = vld [vmem:[%s4464_s1 + $0x188] sm:$0xff] }
0x1115   :  { %3605 = vtanh.f32 %v3988_v1  ;;  %3261 = vmatpush1.bf16.msra.mxu1 %v3260_v0 }
0x1116   :  { %3607 = vpow2.f32 %v2863_v9  ;;  %v1112_v9 = vld [vmem:[%s4464_s1 + $0x198] sm:$0xff] }
0x111f   :  { %v3606_v2 = vpop.eup %3605 }
0x1120   :  { %1076 = vrot.lane.b32.xlu1 %v3606_v2, %s3740_s29  ;;  %v3608_v10 = vpop.eup %3607  ;;  %v3262_v2 = vpack.c.bf16 %v1108_v63, %v1106_v62 }
0x1121   :  { %v1064_v8 = vadd.f32 1.0, %v3608_v10  ;;  %v3264_v10 = vpack.c.bf16 %v1107_v5, %v1105_v4 }
0x1122   :  { %3263 = vmatprep.subr.bf16.mxu1 %v3262_v2 }
0x1123   :  { %3609 = vrcp.f32 %v1064_v8  ;;  %v3266_v8 = vpack.c.bf16 %v1112_v9, %v1110_v6  ;;  %3265 = vmatpush1.bf16.msra.mxu1 %v3264_v10 }
0x1125   :  { %3267 = vmatprep.subr.bf16.mxu1 %v3266_v8 }
0x112d   :  { %v3610_v12 = vpop.eup %3609 }
0x112e   :  { %v1074_v37 = vmul.f32 %v3610_v12, %v1072_v34  ;;  %v1124_v34 = vld [vmem:[%s4464_s1 + $0x1f8] sm:$0xff] }
0x112f   :  { %v3278_v36 = vpack.c.bf16 %v1124_v34, %v1122_v31  ;;  %v4236_v31 = vpack.c.bf16 %v129_v28, %v128_v25 }
0x1192   :  { %v1077_v11 = vpop.permute.xlu1 %1076 }
0x1193   :  { %v1079_v16 = vmul.f32 %v3610_v12, %v1077_v11  ;;  %v1109_v12 = vld [vmem:[%s4464_s1 + $0x180] sm:$0xff]  ;;  %v1111_v11 = vld [vmem:[%s4464_s1 + $0x190] sm:$0xff] }
0x1194   :  { %v3268_v18 = vpack.c.bf16 %v1111_v11, %v1109_v12 }
0x1195   :  { %1081 = vrot.lane.b32.xlu0 %v1079_v16, %s3740_s29  ;;  %v1114_v16 = vld [vmem:[%s4464_s1 + $0x1a8] sm:$0xff] }
0x1196   :  { %v3270_v23 = vpack.c.bf16 %v1116_v13, %v1114_v16  ;;  %3269 = vmatpush1.bf16.msra.mxu1 %v3268_v18  ;;  %v122_v16 = vld [vmem:[%s4466_s3] sm:$0xff]  ;;  %v123_v13 = vld [vmem:[%s4466_s3 + $0x8] sm:$0xff]  ;;  %v124_v18 = vld [vmem:[%s4466_s3 + $0x10] sm:$0xff] }
0x1197   :  { %v4210_v14 = vpack.c.bf16 %v123_v13, %v122_v16  ;;  %v4216_v15 = vpack.c.bf16 %v125_v27, %v124_v18 }
0x1198   :  { %3271 = vmatprep.subr.bf16.mxu1 %v3270_v23  ;;  %v3741_v23 = vmov 0.0|0.0  }
0x1199   :  { %3298 = vmatprep.subr.bf16.mxu0 %v3741_v23 }
0x119a   :  { %3273 = vmatpush1.bf16.msra.mxu1 %v3272_v21  ;;  %v127_v21 = vld [vmem:[%s4466_s3 + $0x28] sm:$0xff]  ;;  %s3743_s3 = smov 6  }
0x119b   :  { %3275 = vmatprep.subr.bf16.mxu1 %v3274_v22  ;;  %v4226_v22 = vpack.c.bf16 %v127_v21, %v126_v20 }
0x119e   :  { %3277 = vmatpush1.bf16.msra.mxu1 %v3276_v35 }
0x119f   :  { %3279 = vmatprep.subr.bf16.mxu1 %v3278_v36 }
0x1207   :  { %v1082_v41 = vpop.permute.xlu0 %1081 }
0x1208   :  { %v4064_v43 = vadd.f32 %v1082_v41, %v1074_v37  ;;  %v1121_v37 = vld [vmem:[%s4464_s1 + $0x1e0] sm:$0xff]  ;;  %v2864_v41 = vmul.f32 -1.442695, %v3988_v1 }
0x1209   :  { %v3280_v40 = vpack.c.bf16 %v1123_v39, %v1121_v37 }
0x120a   :  { %3611 = vtanh.f32 %v4064_v43  ;;  %v1342_v34 = vrot.slane %v4064_v43, 6 }
0x120b   :  { %3281 = vmatpush1.bf16.msra.mxu1 %v3280_v40  ;;  %3613 = vpow2.f32 %v2864_v41 }
0x120c   :  { %3311 = vmatprep.subr.bf16.mxu1 %v4002_v24 }
0x1214   :  { %v3612_v51 = vpop.eup %3611 }
0x1215   :  { %1087 = vrot.lane.b32.xlu1 %v3612_v51, %s3740_s29  ;;  %v3614_v44 = vpop.eup %3613 }
0x1216   :  { %v1065_v45 = vadd.f32 1.0, %v3614_v44 }
0x1218   :  { %3615 = vrcp.f32 %v1065_v45 }
0x1222   :  { %v3616_v46 = vpop.eup %3615 }
0x1287   :  { %v1088_v47 = vpop.permute.xlu1 %1087 }
0x1288   :  { %v1090_v48 = vmul.f32 %v3616_v46, %v1088_v47 }
0x128a   :  { %1091 = vst.msk [vmem:[#allocation3 + $0x8] sm:$0xc0] %vm617_vm5, %v1090_v48  ;;  %1092 = vst.msk [vmem:[#allocation4 - $0x6] sm:$0xc0] %vm617_vm5, %v1090_v48  ;;  %v1252_v49 = vrot.slane %v1090_v48, 6 }
0x128c   :  { %2866 = vmatmul.mubr.msk.f32.vlgmr.msra.gmra.mrb[12].mxu0 %vm148_vm2, %v1252_v49 }
0x128d   :  { %3300 = vmatpush3.bf16.msra.mxu0 %v4210_v14  ;;  %2986 = vmatprep.mubr.msk.f32.mxu0 %vm3742_vm6, %v3739_v7 }
0x128e   :  { %3301 = vmatprep.subr.bf16.mxu0 %v3741_v23 }
0x1291   :  { %v1129_v50 = vld [vmem:[#allocation4] sm:$0xff]  ;;  %v1128_v12 = vld [vmem:[#allocation3 + $0x8] sm:$0xff]  ;;  %3303 = vmatpush3.bf16.msra.mxu0 %v4216_v15 }
0x1292   :  { %1133 = vrot.lane.b32.xlu0 %v1129_v50, %s3740_s29  ;;  %3304 = vmatprep.subr.bf16.mxu0 %v3741_v23 }
0x1295   :  { %3306 = vmatpush3.bf16.msra.mxu0 %v4226_v22 }
0x1296   :  { %3307 = vmatprep.subr.bf16.mxu0 %v3741_v23 }
0x1299   :  { %3309 = vmatpush3.bf16.msra.mxu0 %v4236_v31 }
0x129a   :  { %3326 = vmatprep.subr.bf16.mxu0 %v3741_v23 }
0x1304   :  { %v1134_v51 = vpop.permute.xlu0 %1133 }
0x1305   :  { %v1139_v1 = vsel %vm148_vm2, %v1127_v52, %v1134_v51 }
0x1306   :  { %1217 = vmatmul.mubr.f32.vlgmr.msra.gmra.mrb[8].mxu1 %v1139_v1 }
0x1307   :  { %1222 = vmatprep.mubr.f32.mxu1 %v3739_v7  ;;  %3313 = vmatpush1.bf16.msra.mxu1 %v4013_v17 }
0x1308   :  { %3315 = vmatprep.subr.bf16.mxu1 %v4015_v19 }
0x130b   :  { %3317 = vmatpush1.bf16.msra.mxu1 %v4031_v26 }
0x130c   :  { %3319 = vmatprep.subr.bf16.mxu1 %v4034_v3 }
0x130f   :  { %3321 = vmatpush1.bf16.msra.mxu1 %v4043_v33 }
0x1310   :  { %3323 = vmatprep.subr.bf16.mxu1 %v4054_v38 }
0x1313   :  { %3325 = vmatpush1.bf16.msra.mxu1 %v4062_v42 }
0x1314   :  { %3339 = vmatprep.subr.bf16.mxu1 %v4002_v24 }
0x135f   :  { %v1321_v53 = vpop.f32.mrb[12].mxu0 }
0x1360   :  { %v1323_v54 = vpop.f32.mrb[13].mxu0 }
0x13d9   :  { %v1218_v58 = vpop.f32.mrb[8].mxu1 }
0x13da   :  { %v1219_v59 = vadd.f32 %v1218_v58, %v4187_v56  ;;  %v1220_v60 = vpop.f32.mrb[9].mxu1 }
0x13db   :  { %v1221_v61 = vadd.f32 %v1220_v60, %v4191_v57 }
0x13dc   :  { %1229 = vst [vmem:[#allocation2] sm:$0xff] %v1219_v59 }
0x13dd   :  { %1230 = vst [vmem:[#allocation2 + $0x8] sm:$0xff] %v1221_v61 }
0x13e3   :  { %v1249_v29 = vld [vmem:[#allocation2] sm:$0x3]  ;;  %v1442_v59 = vld [vmem:[#allocation2] sm:$0xc] }
0x13e4   :  { %v1250_v62 = vld [vmem:[#allocation2 + $0x8] sm:$0x3]  ;;  %v1326_v32 = vadd.f32 %v1321_v53, %v1249_v29  ;;  %v1443_v55 = vld [vmem:[#allocation2 + $0x8] sm:$0xc]  ;;  %v1642_v28 = vld [vmem:[#allocation2 + $0x8] sm:$0x30] }
0x13e5   :  { %v1327_v63 = vadd.f32 %v1323_v54, %v1250_v62 }
0x13e6   :  { %v2867_v2 = vmul.f32 -1.442695, %v1326_v32 }
0x13e7   :  { %3617 = vtanh.f32 %v1327_v63  ;;  %v2868_v40 = vmul.f32 -1.442695, %v1327_v63 }
0x13e8   :  { %3619 = vpow2.f32 %v2867_v2 }
0x13f1   :  { %v3618_v0 = vpop.eup %3617 }
0x13f2   :  { %1346 = vrot.lane.b32.xlu1 %v3618_v0, %s3740_s29  ;;  %v3620_v4 = vpop.eup %3619 }
0x13f3   :  { %v1334_v5 = vadd.f32 1.0, %v3620_v4 }
0x13f5   :  { %3621 = vrcp.f32 %v1334_v5 }
0x13f6   :  { %1135 = vrot.lane.b32.xlu1 %v1130_v30, %s3740_s29 }
0x13ff   :  { %v3622_v6 = vpop.eup %3621 }
0x1400   :  { %v1344_v35 = vmul.f32 %v3622_v6, %v1342_v34 }
0x1464   :  { %v1347_v9 = vpop.permute.xlu1 %1346 }
0x1465   :  { %v1349_v10 = vmul.f32 %v3622_v6, %v1347_v9 }
0x1467   :  { %1351 = vrot.lane.b32.xlu0 %v1349_v10, %s3740_s29 }
0x1468   :  { %v1136_v8 = vpop.permute.xlu1 %1135 }
0x1469   :  { %v1140_v11 = vsel %vm148_vm2, %v1128_v12, %v1136_v8 }
0x146a   :  { %1223 = vmatmul.mubr.f32.gmra.mrb[10].mxu1 %v1140_v11 }
0x146b   :  { %1508 = vmatprep.mubr.f32.mxu1 %v3739_v7 }
0x14d9   :  { %v1352_v36 = vpop.permute.xlu0 %1351 }
0x14da   :  { %v4242_v37 = vadd.f32 %v1352_v36, %v1344_v35 }
0x14dc   :  { %3623 = vtanh.f32 %v4242_v37  ;;  %v1537_v32 = vrot.slane %v4242_v37, 6  ;;  %v1641_v37 = vld [vmem:[#allocation2] sm:$0x30] }
0x14dd   :  { %3625 = vpow2.f32 %v2868_v40 }
0x14e6   :  { %v3624_v39 = vpop.eup %3623 }
0x14e7   :  { %1357 = vrot.lane.b32.xlu0 %v3624_v39, %s3740_s29  ;;  %v3626_v46 = vpop.eup %3625 }
0x14e8   :  { %v1335_v47 = vadd.f32 1.0, %v3626_v46 }
0x14ea   :  { %3627 = vrcp.f32 %v1335_v47 }
0x14f4   :  { %v3628_v48 = vpop.eup %3627 }
0x153d   :  { %v1224_v41 = vpop.f32.mrb[10].mxu1 }
0x153e   :  { %v1225_v44 = vadd.f32 %v1224_v41, %v4187_v56  ;;  %v1226_v45 = vpop.f32.mrb[11].mxu1 }
0x153f   :  { %v1227_v43 = vadd.f32 %v1226_v45, %v4191_v57 }
0x1540   :  { %1231 = vst [vmem:[#allocation2 + $0x10] sm:$0xff] %v1225_v44 }
0x1541   :  { %1232 = vst [vmem:[#allocation2 + $0x18] sm:$0xff] %v1227_v43 }
0x1559   :  { %v1358_v49 = vpop.permute.xlu0 %1357 }
0x155a   :  { %v1360_v50 = vmul.f32 %v3628_v48, %v1358_v49 }
0x155c   :  { %2987 = vmatmul.mubr.msk.f32.vlgmr.msra.gmra.mrb[14].mxu0 %vm148_vm2, %v1360_v50  ;;  %2870 = vmatmul.mubr.msk.f32.vlgmr.msra.gmra.mrb[12].mxu1 %vm148_vm2, %v1360_v50 }
0x155d   :  { %3328 = vmatpush3.bf16.msra.mxu0 %v4210_v14  ;;  %3341 = vmatpush1.bf16.msra.mxu1 %v4013_v17 }
0x155e   :  { %3329 = vmatprep.subr.bf16.mxu0 %v3741_v23  ;;  %3343 = vmatprep.subr.bf16.mxu1 %v4015_v19 }
0x155f   :  { %3005 = vmatprep.mubr.msk.f32.mxu0 %vm3742_vm6, %v3739_v7  ;;  %1707 = vmatprep.mubr.f32.mxu1 %v3739_v7 }
0x1561   :  { %3331 = vmatpush3.bf16.msra.mxu0 %v4216_v15  ;;  %3345 = vmatpush1.bf16.msra.mxu1 %v4031_v26 }
0x1562   :  { %3332 = vmatprep.subr.bf16.mxu0 %v3741_v23  ;;  %3347 = vmatprep.subr.bf16.mxu1 %v4034_v3 }
0x1565   :  { %3334 = vmatpush3.bf16.msra.mxu0 %v4226_v22  ;;  %3349 = vmatpush1.bf16.msra.mxu1 %v4043_v33 }
0x1566   :  { %3335 = vmatprep.subr.bf16.mxu0 %v3741_v23  ;;  %3351 = vmatprep.subr.bf16.mxu1 %v4054_v38 }
0x1569   :  { %3337 = vmatpush3.bf16.msra.mxu0 %v4236_v31  ;;  %3353 = vmatpush1.bf16.msra.mxu1 %v4062_v42 }
0x156a   :  { %3354 = vmatprep.subr.bf16.mxu0 %v3741_v23  ;;  %3367 = vmatprep.subr.bf16.mxu1 %v4002_v24 }
0x162f   :  { %v4271_v51 = vpop.f32.mrb[14].mxu0  ;;  %v1510_v52 = vpop.f32.mrb[12].mxu1 }
0x1630   :  { %1435 = vst.msk [vmem:[#allocation5] sm:$0x3] %vm1434_vm7, %v4271_v51  ;;  %v2988_v1 = vpop.f32.mrb[15].mxu0  ;;  %v1512_v53 = vpop.f32.mrb[13].mxu1  ;;  %v1517_v58 = vrot.slane %v1510_v52, 6 }
0x1631   :  { %v1518_v54 = vrot.slane %v1512_v53, 6 }
0x1632   :  { %v1521_v60 = vadd.f32 %v1517_v58, %v1442_v59 }
0x1633   :  { %v1522_v56 = vadd.f32 %v1518_v54, %v1443_v55 }
0x1634   :  { %v2871_v61 = vmul.f32 -1.442695, %v1521_v60 }
0x1635   :  { %3629 = vtanh.f32 %v1522_v56  ;;  %v2872_v9 = vmul.f32 -1.442695, %v1522_v56 }
0x1636   :  { %3631 = vpow2.f32 %v2871_v61 }
0x163f   :  { %v3630_v57 = vpop.eup %3629 }
0x1640   :  { %1541 = vrot.lane.b32.xlu1 %v3630_v57, %s3740_s29  ;;  %v3632_v62 = vpop.eup %3631 }
0x1641   :  { %v1529_v63 = vadd.f32 1.0, %v3632_v62 }
0x1643   :  { %3633 = vrcp.f32 %v1529_v63 }
0x164d   :  { %v3634_v0 = vpop.eup %3633 }
0x164e   :  { %v1539_v2 = vmul.f32 %v3634_v0, %v1537_v32 }
0x16b2   :  { %v1542_v30 = vpop.permute.xlu1 %1541 }
0x16b3   :  { %v1544_v29 = vmul.f32 %v3634_v0, %v1542_v30  ;;  %v1841_v0 = vld [vmem:[#allocation2 + $0x8] sm:$0xc0] }
0x16b5   :  { %1546 = vrot.lane.b32.xlu0 %v1544_v29, %s3740_s29 }
0x1727   :  { %v1547_v4 = vpop.permute.xlu0 %1546 }
0x1728   :  { %v1549_v5 = vadd.f32 %v1547_v4, %v1539_v2  ;;  %v1840_v2 = vld [vmem:[#allocation2] sm:$0xc0] }
0x172a   :  { %3635 = vtanh.f32 %v1549_v5  ;;  %v1736_v47 = vrot.slane %v1549_v5, 6 }
0x172b   :  { %3637 = vpow2.f32 %v2872_v9 }
0x1734   :  { %v3636_v6 = vpop.eup %3635 }
0x1735   :  { %1552 = vrot.lane.b32.xlu1 %v3636_v6, %s3740_s29  ;;  %v3638_v10 = vpop.eup %3637 }
0x1736   :  { %v1530_v8 = vadd.f32 1.0, %v3638_v10 }
0x1738   :  { %3639 = vrcp.f32 %v1530_v8 }
0x1742   :  { %v3640_v12 = vpop.eup %3639 }
0x17a7   :  { %v1553_v11 = vpop.permute.xlu1 %1552 }
0x17a8   :  { %v1555_v16 = vmul.f32 %v3640_v12, %v1553_v11 }
0x17aa   :  { %v1557_v13 = vrot.slane %v1555_v16, 2 }
0x17ac   :  { %3006 = vmatmul.mubr.msk.f32.vlgmr.msra.gmra.mrb[16].mxu0 %vm148_vm2, %v1557_v13  ;;  %2874 = vmatmul.mubr.msk.f32.vlgmr.msra.gmra.mrb[14].mxu1 %vm148_vm2, %v1557_v13 }
0x17ad   :  { %3356 = vmatpush3.bf16.msra.mxu0 %v4210_v14  ;;  %3369 = vmatpush1.bf16.msra.mxu1 %v4013_v17 }
0x17ae   :  { %3357 = vmatprep.subr.bf16.mxu0 %v3741_v23  ;;  %3371 = vmatprep.subr.bf16.mxu1 %v4015_v19 }
0x17af   :  { %3024 = vmatprep.mubr.msk.f32.mxu0 %vm3742_vm6, %v3739_v7  ;;  %1906 = vmatprep.mubr.f32.mxu1 %v3739_v7 }
0x17b1   :  { %3359 = vmatpush3.bf16.msra.mxu0 %v4216_v15  ;;  %3373 = vmatpush1.bf16.msra.mxu1 %v4031_v26 }
0x17b2   :  { %3360 = vmatprep.subr.bf16.mxu0 %v3741_v23  ;;  %3375 = vmatprep.subr.bf16.mxu1 %v4034_v3 }
0x17b5   :  { %3362 = vmatpush3.bf16.msra.mxu0 %v4226_v22  ;;  %3377 = vmatpush1.bf16.msra.mxu1 %v4043_v33 }
0x17b6   :  { %3363 = vmatprep.subr.bf16.mxu0 %v3741_v23  ;;  %3379 = vmatprep.subr.bf16.mxu1 %v4054_v38 }
0x17b9   :  { %3365 = vmatpush3.bf16.msra.mxu0 %v4236_v31  ;;  %3381 = vmatpush1.bf16.msra.mxu1 %v4062_v42 }
0x17ba   :  { %3382 = vmatprep.subr.bf16.mxu0 %v3741_v23  ;;  %3395 = vmatprep.subr.bf16.mxu1 %v4002_v24 }
0x187f   :  { %v4300_v18 = vpop.f32.mrb[16].mxu0  ;;  %v1709_v27 = vpop.f32.mrb[14].mxu1 }
0x1880   :  { %v3007_v20 = vpop.f32.mrb[17].mxu0  ;;  %v1711_v21 = vpop.f32.mrb[15].mxu1  ;;  %v1716_v36 = vrot.slane %v1709_v27, 4 }
0x1881   :  { %v1717_v25 = vrot.slane %v1711_v21, 4 }
0x1882   :  { %v1720_v39 = vadd.f32 %v1716_v36, %v1641_v37 }
0x1883   :  { %v1721_v34 = vadd.f32 %v1717_v25, %v1642_v28 }
0x1884   :  { %v2875_v40 = vmul.f32 -1.442695, %v1720_v39 }
0x1885   :  { %3641 = vtanh.f32 %v1721_v34  ;;  %v2876_v1 = vmul.f32 -1.442695, %v1721_v34 }
0x1886   :  { %3643 = vpow2.f32 %v2875_v40 }
0x188f   :  { %v3642_v35 = vpop.eup %3641 }
0x1890   :  { %1740 = vrot.lane.b32.xlu0 %v3642_v35, %s3740_s29  ;;  %v3644_v41 = vpop.eup %3643 }
0x1891   :  { %v1728_v44 = vadd.f32 1.0, %v3644_v41 }
0x1893   :  { %3645 = vrcp.f32 %v1728_v44  ;;  %v2037_v44 = vld [vmem:[#allocation2 + $0x18] sm:$0x3] }
0x189d   :  { %v3646_v45 = vpop.eup %3645 }
0x189e   :  { %v1738_v48 = vmul.f32 %v3646_v45, %v1736_v47  ;;  %v2036_v47 = vld [vmem:[#allocation2 + $0x10] sm:$0x3] }
0x1902   :  { %v1741_v43 = vpop.permute.xlu0 %1740 }
0x1903   :  { %v1743_v46 = vmul.f32 %v3646_v45, %v1741_v43 }
0x1905   :  { %1745 = vrot.lane.b32.xlu1 %v1743_v46, %s3740_s29 }
0x1977   :  { %v1746_v49 = vpop.permute.xlu1 %1745 }
0x1978   :  { %v1748_v50 = vadd.f32 %v1746_v49, %v1738_v48 }
0x197a   :  { %3647 = vtanh.f32 %v1748_v50  ;;  %v1935_v11 = vrot.slane %v1748_v50, 6 }
0x197b   :  { %3649 = vpow2.f32 %v2876_v1 }
0x1984   :  { %v3648_v52 = vpop.eup %3647 }
0x1985   :  { %1751 = vrot.lane.b32.xlu0 %v3648_v52, %s3740_s29  ;;  %v3650_v53 = vpop.eup %3649 }
0x1986   :  { %v1729_v54 = vadd.f32 1.0, %v3650_v53 }
0x1988   :  { %3651 = vrcp.f32 %v1729_v54 }
0x1992   :  { %v3652_v55 = vpop.eup %3651 }
0x19f7   :  { %v1752_v56 = vpop.permute.xlu0 %1751 }
0x19f8   :  { %v1754_v57 = vmul.f32 %v3652_v55, %v1752_v56 }
0x19fa   :  { %v1756_v58 = vrot.slane %v1754_v57, 4 }
0x19fc   :  { %3025 = vmatmul.mubr.msk.f32.vlgmr.msra.gmra.mrb[18].mxu0 %vm148_vm2, %v1756_v58  ;;  %2878 = vmatmul.mubr.msk.f32.vlgmr.msra.gmra.mrb[16].mxu1 %vm148_vm2, %v1756_v58 }
0x19fd   :  { %3384 = vmatpush3.bf16.msra.mxu0 %v4210_v14  ;;  %3397 = vmatpush1.bf16.msra.mxu1 %v4013_v17 }
0x19fe   :  { %3385 = vmatprep.subr.bf16.mxu0 %v3741_v23  ;;  %3399 = vmatprep.subr.bf16.mxu1 %v4015_v19 }
0x19ff   :  { %3043 = vmatprep.mubr.msk.f32.mxu0 %vm3742_vm6, %v3739_v7  ;;  %2102 = vmatprep.mubr.f32.mxu1 %v3739_v7 }
0x1a01   :  { %3387 = vmatpush3.bf16.msra.mxu0 %v4216_v15  ;;  %3401 = vmatpush1.bf16.msra.mxu1 %v4031_v26 }
0x1a02   :  { %3388 = vmatprep.subr.bf16.mxu0 %v3741_v23  ;;  %3403 = vmatprep.subr.bf16.mxu1 %v4034_v3 }
0x1a05   :  { %3390 = vmatpush3.bf16.msra.mxu0 %v4226_v22  ;;  %3405 = vmatpush1.bf16.msra.mxu1 %v4043_v33 }
0x1a06   :  { %3391 = vmatprep.subr.bf16.mxu0 %v3741_v23  ;;  %3407 = vmatprep.subr.bf16.mxu1 %v4054_v38 }
0x1a09   :  { %3393 = vmatpush3.bf16.msra.mxu0 %v4236_v31  ;;  %3409 = vmatpush1.bf16.msra.mxu1 %v4062_v42 }
0x1a0a   :  { %3410 = vmatprep.subr.bf16.mxu0 %v3741_v23  ;;  %3423 = vmatprep.subr.bf16.mxu1 %v4002_v24 }
0x1acf   :  { %v4326_v59 = vpop.f32.mrb[18].mxu0  ;;  %v1908_v60 = vpop.f32.mrb[16].mxu1 }
0x1ad0   :  { %v3026_v61 = vpop.f32.mrb[19].mxu0  ;;  %v1910_v62 = vpop.f32.mrb[17].mxu1  ;;  %v1915_v32 = vrot.slane %v1908_v60, 2 }
0x1ad1   :  { %v1916_v63 = vrot.slane %v1910_v62, 2 }
0x1ad2   :  { %v1919_v4 = vadd.f32 %v1915_v32, %v1840_v2 }
0x1ad3   :  { %v1920_v30 = vadd.f32 %v1916_v63, %v1841_v0 }
0x1ad4   :  { %v2879_v5 = vmul.f32 -1.442695, %v1919_v4 }
0x1ad5   :  { %3653 = vtanh.f32 %v1920_v30  ;;  %v2880_v21 = vmul.f32 -1.442695, %v1920_v30 }
0x1ad6   :  { %3655 = vpow2.f32 %v2879_v5 }
0x1adf   :  { %v3654_v29 = vpop.eup %3653 }
0x1ae0   :  { %1939 = vrot.lane.b32.xlu1 %v3654_v29, %s3740_s29  ;;  %v3656_v6 = vpop.eup %3655 }
0x1ae1   :  { %v1927_v9 = vadd.f32 1.0, %v3656_v6 }
0x1ae3   :  { %3657 = vrcp.f32 %v1927_v9  ;;  %v2227_v9 = vld [vmem:[#allocation2 + $0x18] sm:$0xc] }
0x1aed   :  { %v3658_v10 = vpop.eup %3657 }
0x1aee   :  { %v1937_v16 = vmul.f32 %v3658_v10, %v1935_v11  ;;  %v2226_v11 = vld [vmem:[#allocation2 + $0x10] sm:$0xc] }
0x1b52   :  { %v1940_v8 = vpop.permute.xlu1 %1939 }
0x1b53   :  { %v1942_v12 = vmul.f32 %v3658_v10, %v1940_v8 }
0x1b55   :  { %1944 = vrot.lane.b32.xlu0 %v1942_v12, %s3740_s29 }
0x1bc7   :  { %v1945_v13 = vpop.permute.xlu0 %1944 }
0x1bc8   :  { %v1947_v27 = vadd.f32 %v1945_v13, %v1937_v16 }
0x1bca   :  { %3659 = vtanh.f32 %v1947_v27  ;;  %v2125_v55 = vrot.slane %v1947_v27, 6 }
0x1bcb   :  { %3661 = vpow2.f32 %v2880_v21 }
0x1bd4   :  { %v3660_v20 = vpop.eup %3659 }
0x1bd5   :  { %1950 = vrot.lane.b32.xlu1 %v3660_v20, %s3740_s29  ;;  %v3662_v25 = vpop.eup %3661 }
0x1bd6   :  { %v1928_v28 = vadd.f32 1.0, %v3662_v25 }
0x1bd8   :  { %3663 = vrcp.f32 %v1928_v28 }
0x1be2   :  { %v3664_v34 = vpop.eup %3663 }
0x1c47   :  { %v1951_v35 = vpop.permute.xlu1 %1950 }
0x1c48   :  { %v1953_v36 = vmul.f32 %v3664_v34, %v1951_v35 }
0x1c4a   :  { %v1955_v37 = vrot.slane %v1953_v36, 6 }
0x1c4c   :  { %3044 = vmatmul.mubr.msk.f32.vlgmr.msra.gmra.mrb[20].mxu0 %vm148_vm2, %v1955_v37  ;;  %2882 = vmatmul.mubr.msk.f32.vlgmr.msra.gmra.mrb[18].mxu1 %vm148_vm2, %v1955_v37 }
0x1c4d   :  { %3412 = vmatpush3.bf16.msra.mxu0 %v4210_v14  ;;  %3425 = vmatpush1.bf16.msra.mxu1 %v4013_v17 }
0x1c4e   :  { %3413 = vmatprep.subr.bf16.mxu0 %v3741_v23  ;;  %3427 = vmatprep.subr.bf16.mxu1 %v4015_v19 }
0x1c4f   :  { %3062 = vmatprep.mubr.msk.f32.mxu0 %vm3742_vm6, %v3739_v7  ;;  %2292 = vmatprep.mubr.f32.mxu1 %v3739_v7 }
0x1c51   :  { %3415 = vmatpush3.bf16.msra.mxu0 %v4216_v15  ;;  %3429 = vmatpush1.bf16.msra.mxu1 %v4031_v26 }
0x1c52   :  { %3416 = vmatprep.subr.bf16.mxu0 %v3741_v23  ;;  %3431 = vmatprep.subr.bf16.mxu1 %v4034_v3 }
0x1c55   :  { %3418 = vmatpush3.bf16.msra.mxu0 %v4226_v22  ;;  %3433 = vmatpush1.bf16.msra.mxu1 %v4043_v33 }
0x1c56   :  { %3419 = vmatprep.subr.bf16.mxu0 %v3741_v23  ;;  %3435 = vmatprep.subr.bf16.mxu1 %v4054_v38 }
0x1c59   :  { %3437 = vmatpush1.bf16.msra.mxu1 %v4062_v42  ;;  %3421 = vmatpush3.bf16.msra.mxu0 %v4236_v31 }
0x1c5a   :  { %3438 = vmatprep.subr.bf16.mxu0 %v3741_v23  ;;  %3451 = vmatprep.subr.bf16.mxu1 %v4002_v24 }
0x1d1f   :  { %v4352_v39 = vpop.f32.mrb[20].mxu0  ;;  %v2104_v40 = vpop.f32.mrb[18].mxu1 }
0x1d20   :  { %v3045_v41 = vpop.f32.mrb[21].mxu0  ;;  %v2106_v45 = vpop.f32.mrb[19].mxu1  ;;  %v2109_v48 = vadd.f32 %v2104_v40, %v2036_v47 }
0x1d21   :  { %v2110_v43 = vadd.f32 %v2106_v45, %v2037_v44 }
0x1d22   :  { %v2883_v49 = vmul.f32 -1.442695, %v2109_v48 }
0x1d23   :  { %3665 = vtanh.f32 %v2110_v43  ;;  %v2884_v61 = vmul.f32 -1.442695, %v2110_v43 }
0x1d24   :  { %3667 = vpow2.f32 %v2883_v49  ;;  %v2424_v49 = vld [vmem:[#allocation2 + $0x18] sm:$0x30] }
0x1d2d   :  { %v3666_v46 = vpop.eup %3665 }
0x1d2e   :  { %2129 = vrot.lane.b32.xlu0 %v3666_v46, %s3740_s29  ;;  %v3668_v50 = vpop.eup %3667 }
0x1d2f   :  { %v2117_v52 = vadd.f32 1.0, %v3668_v50 }
0x1d31   :  { %3669 = vrcp.f32 %v2117_v52 }
0x1d3b   :  { %v3670_v1 = vpop.eup %3669 }
0x1d3c   :  { %v2127_v56 = vmul.f32 %v3670_v1, %v2125_v55 }
0x1da0   :  { %v2130_v53 = vpop.permute.xlu0 %2129 }
0x1da1   :  { %v2132_v54 = vmul.f32 %v3670_v1, %v2130_v53 }
0x1da3   :  { %2134 = vrot.lane.b32.xlu1 %v2132_v54, %s3740_s29 }
0x1e15   :  { %v2135_v57 = vpop.permute.xlu1 %2134 }
0x1e16   :  { %v2137_v58 = vadd.f32 %v2135_v57, %v2127_v56 }
0x1e18   :  { %3671 = vtanh.f32 %v2137_v58  ;;  %v2321_v28 = vrot.slane %v2137_v58, 6 }
0x1e19   :  { %3673 = vpow2.f32 %v2884_v61 }
0x1e22   :  { %v3672_v60 = vpop.eup %3671 }
0x1e23   :  { %2140 = vrot.lane.b32.xlu0 %v3672_v60, %s3740_s29  ;;  %v3674_v62 = vpop.eup %3673 }
0x1e24   :  { %v2118_v63 = vadd.f32 1.0, %v3674_v62 }
0x1e26   :  { %3675 = vrcp.f32 %v2118_v63 }
0x1e30   :  { %v3676_v0 = vpop.eup %3675 }
0x1e95   :  { %v2141_v30 = vpop.permute.xlu0 %2140 }
0x1e96   :  { %v2143_v29 = vmul.f32 %v3676_v0, %v2141_v30 }
0x1e98   :  { %3063 = vmatmul.mubr.msk.f32.vlgmr.msra.gmra.mrb[22].mxu0 %vm148_vm2, %v2143_v29  ;;  %2886 = vmatmul.mubr.msk.f32.vlgmr.msra.gmra.mrb[20].mxu1 %vm148_vm2, %v2143_v29 }
0x1e99   :  { %3440 = vmatpush3.bf16.msra.mxu0 %v4210_v14  ;;  %3453 = vmatpush1.bf16.msra.mxu1 %v4013_v17 }
0x1e9a   :  { %3441 = vmatprep.subr.bf16.mxu0 %v3741_v23  ;;  %3455 = vmatprep.subr.bf16.mxu1 %v4015_v19 }
0x1e9b   :  { %3081 = vmatprep.mubr.msk.f32.mxu0 %vm3742_vm6, %v3739_v7  ;;  %2489 = vmatprep.mubr.f32.mxu1 %v3739_v7 }
0x1e9d   :  { %3443 = vmatpush3.bf16.msra.mxu0 %v4216_v15  ;;  %3457 = vmatpush1.bf16.msra.mxu1 %v4031_v26 }
0x1e9e   :  { %3444 = vmatprep.subr.bf16.mxu0 %v3741_v23  ;;  %3459 = vmatprep.subr.bf16.mxu1 %v4034_v3 }
0x1ea1   :  { %3446 = vmatpush3.bf16.msra.mxu0 %v4226_v22  ;;  %3461 = vmatpush1.bf16.msra.mxu1 %v4043_v33 }
0x1ea2   :  { %3447 = vmatprep.subr.bf16.mxu0 %v3741_v23  ;;  %3463 = vmatprep.subr.bf16.mxu1 %v4054_v38 }
0x1ea5   :  { %3449 = vmatpush3.bf16.msra.mxu0 %v4236_v31  ;;  %3465 = vmatpush1.bf16.msra.mxu1 %v4062_v42 }
0x1ea6   :  { %3466 = vmatprep.subr.bf16.mxu0 %v3741_v23  ;;  %3479 = vmatprep.subr.bf16.mxu1 %v4002_v24 }
0x1f6b   :  { %v4378_v32 = vpop.f32.mrb[22].mxu0  ;;  %v2294_v2 = vpop.f32.mrb[20].mxu1 }
0x1f6c   :  { %v3064_v4 = vpop.f32.mrb[23].mxu0  ;;  %v2296_v5 = vpop.f32.mrb[21].mxu1  ;;  %v2301_v12 = vrot.slane %v2294_v2, 6 }
0x1f6d   :  { %v2302_v6 = vrot.slane %v2296_v5, 6 }
0x1f6e   :  { %v2305_v16 = vadd.f32 %v2301_v12, %v2226_v11  ;;  %v2618_v11 = vld [vmem:[#allocation2 + $0x18] sm:$0xc0] }
0x1f6f   :  { %v2306_v10 = vadd.f32 %v2302_v6, %v2227_v9 }
0x1f70   :  { %v2887_v13 = vmul.f32 -1.442695, %v2305_v16 }
0x1f71   :  { %3677 = vtanh.f32 %v2306_v10  ;;  %v2888_v40 = vmul.f32 -1.442695, %v2306_v10 }
0x1f72   :  { %3679 = vpow2.f32 %v2887_v13  ;;  %v2617_v13 = vld [vmem:[#allocation2 + $0x10] sm:$0xc0] }
0x1f7b   :  { %v3678_v8 = vpop.eup %3677 }
0x1f7c   :  { %2325 = vrot.lane.b32.xlu1 %v3678_v8, %s3740_s29  ;;  %v3680_v27 = vpop.eup %3679 }
0x1f7d   :  { %v2313_v20 = vadd.f32 1.0, %v3680_v27 }
0x1f7f   :  { %3681 = vrcp.f32 %v2313_v20 }
0x1f89   :  { %v3682_v24 = vpop.eup %3681 }
0x1f8a   :  { %v2323_v34 = vmul.f32 %v3682_v24, %v2321_v28 }
0x1fee   :  { %v2326_v21 = vpop.permute.xlu1 %2325 }
0x1fef   :  { %v2328_v25 = vmul.f32 %v3682_v24, %v2326_v21 }
0x1ff1   :  { %2330 = vrot.lane.b32.xlu0 %v2328_v25, %s3740_s29 }
0x2063   :  { %v2331_v35 = vpop.permute.xlu0 %2330 }
0x2064   :  { %v2333_v36 = vadd.f32 %v2331_v35, %v2323_v34 }
0x2066   :  { %3683 = vtanh.f32 %v2333_v36  ;;  %v2518_v58 = vrot.slane %v2333_v36, 6 }
0x2067   :  { %3685 = vpow2.f32 %v2888_v40 }
0x2070   :  { %v3684_v37 = vpop.eup %3683 }
0x2071   :  { %2336 = vrot.lane.b32.xlu1 %v3684_v37, %s3740_s29  ;;  %v3686_v41 = vpop.eup %3685 }
0x2072   :  { %v2314_v44 = vadd.f32 1.0, %v3686_v41 }
0x2074   :  { %3687 = vrcp.f32 %v2314_v44 }
0x207e   :  { %v3688_v45 = vpop.eup %3687 }
0x20e3   :  { %v2337_v43 = vpop.permute.xlu1 %2336 }
0x20e4   :  { %v2339_v46 = vmul.f32 %v3688_v45, %v2337_v43 }
0x20e6   :  { %v2341_v47 = vrot.slane %v2339_v46, 2 }
0x20e8   :  { %3082 = vmatmul.mubr.msk.f32.vlgmr.msra.gmra.mrb[24].mxu0 %vm148_vm2, %v2341_v47  ;;  %2890 = vmatmul.mubr.msk.f32.vlgmr.msra.gmra.mrb[22].mxu1 %vm148_vm2, %v2341_v47 }
0x20e9   :  { %3468 = vmatpush3.bf16.msra.mxu0 %v4210_v14  ;;  %3481 = vmatpush1.bf16.msra.mxu1 %v4013_v17 }
0x20ea   :  { %3469 = vmatprep.subr.bf16.mxu0 %v3741_v23  ;;  %3483 = vmatprep.subr.bf16.mxu1 %v4015_v19 }
0x20eb   :  { %3100 = vmatprep.mubr.msk.f32.mxu0 %vm3742_vm6, %v3739_v7  ;;  %2683 = vmatprep.mubr.f32.mxu1 %v3739_v7 }
0x20ed   :  { %3471 = vmatpush3.bf16.msra.mxu0 %v4216_v15  ;;  %3485 = vmatpush1.bf16.msra.mxu1 %v4031_v26 }
0x20ee   :  { %3472 = vmatprep.subr.bf16.mxu0 %v3741_v23  ;;  %3487 = vmatprep.subr.bf16.mxu1 %v4034_v3 }
0x20f1   :  { %3474 = vmatpush3.bf16.msra.mxu0 %v4226_v22  ;;  %3489 = vmatpush1.bf16.msra.mxu1 %v4043_v33 }
0x20f2   :  { %3475 = vmatprep.subr.bf16.mxu0 %v3741_v23  ;;  %3491 = vmatprep.subr.bf16.mxu1 %v4054_v38  ;;  %v2423_v38 = vld [vmem:[#allocation2 + $0x10] sm:$0x30] }
0x20f5   :  { %3477 = vmatpush3.bf16.msra.mxu0 %v4236_v31  ;;  %3493 = vmatpush1.bf16.msra.mxu1 %v4062_v42 }
0x20f6   :  { %3494 = vmatprep.subr.bf16.mxu0 %v3741_v23 }
0x21bb   :  { %v4403_v17 = vpop.f32.mrb[24].mxu0  ;;  %v2491_v19 = vpop.f32.mrb[22].mxu1 }
0x21bc   :  { %v3083_v26 = vpop.f32.mrb[25].mxu0  ;;  %v2493_v48 = vpop.f32.mrb[23].mxu1  ;;  %v2498_v52 = vrot.slane %v2491_v19, 4 }
0x21bd   :  { %v2499_v3 = vrot.slane %v2493_v48, 4 }
0x21be   :  { %v2502_v1 = vadd.f32 %v2498_v52, %v2423_v38 }
0x21bf   :  { %v2503_v50 = vadd.f32 %v2499_v3, %v2424_v49  ;;  %v2814_v49 = vld [vmem:[%s4465_s2 + $0x2] sm:$0x1]  ;;  %s3751_s2 = smov [#allocation7]  }
0x21c0   :  { %v2891_v53 = vmul.f32 -1.442695, %v2502_v1  ;;  %3506 = vpush %v2814_v49  ;;  %s2832_s1 = sshll.u32 %s3751_s2, 4  ;;  %s2833_s1 = int_to_ptr.vmem [resolvable:$true] %s2832_s1 }
0x21c1   :  { %3689 = vtanh.f32 %v2503_v50  ;;  %v2892_v0 = vmul.f32 -1.442695, %v2503_v50  ;;  %s3715_s23 = scalar_lea.vmem %s2833_s1, 32  ;;  %p3720_p1 = scmp.lt.s32.totalorder %s2833_s1, %s2833_s1 }
0x21c2   :  { %3691 = vpow2.f32 %v2891_v53  ;;  %p3716_p0 = scmp.ne.s32.totalorder %s2833_s1, %s3715_s23  ;;  %p3721_p2 = scmp.lt.s32.totalorder %s3715_s23, %s3715_s23 }
0x21c4   :  { %p3722_p3 = por %p3721_p2, %p3720_p1 }
0x21c6   :  { %p3723_p4 = pnand %p3722_p3, %p3716_p0 }
0x21cb   :  { %v3690_v33 = vpop.eup %3689 }
0x21cc   :  { %2522 = vrot.lane.b32.xlu0 %v3690_v33, %s3740_s29  ;;  %v3692_v42 = vpop.eup %3691 }
0x21cd   :  { %v2510_v54 = vadd.f32 1.0, %v3692_v42 }
0x21cf   :  { %3693 = vrcp.f32 %v2510_v54 }
0x21d9   :  { %v3694_v55 = vpop.eup %3693 }
0x21da   :  { %v2520_v60 = vmul.f32 %v3694_v55, %v2518_v58 }
0x21f1   :  { %s3507_s22 = spop %3506 }
0x21f2   :  { %v2820_v42 = vstv %s3507_s22 }
0x223e   :  { %v2523_v56 = vpop.permute.xlu0 %2522 }
0x223f   :  { %v2525_v57 = vmul.f32 %v3694_v55, %v2523_v56 }
0x2241   :  { %2527 = vrot.lane.b32.xlu1 %v2525_v57, %s3740_s29 }
0x22b3   :  { %v2528_v61 = vpop.permute.xlu1 %2527 }
0x22b4   :  { %v2530_v62 = vadd.f32 %v2528_v61, %v2520_v60 }
0x22b6   :  { %3695 = vtanh.f32 %v2530_v62  ;;  %v2712_v25 = vrot.slane %v2530_v62, 6 }
0x22b7   :  { %3697 = vpow2.f32 %v2892_v0 }
0x22c0   :  { %v3696_v63 = vpop.eup %3695 }
0x22c1   :  { %2533 = vrot.lane.b32.xlu0 %v3696_v63, %s3740_s29  ;;  %v3698_v30 = vpop.eup %3697 }
0x22c2   :  { %v2511_v29 = vadd.f32 1.0, %v3698_v30 }
0x22c4   :  { %3699 = vrcp.f32 %v2511_v29 }
0x22ce   :  { %v3700_v2 = vpop.eup %3699 }
0x2333   :  { %v2534_v4 = vpop.permute.xlu0 %2533 }
0x2334   :  { %v2536_v5 = vmul.f32 %v3700_v2, %v2534_v4 }
0x2336   :  { %v2538_v6 = vrot.slane %v2536_v5, 4 }
0x2338   :  { %3101 = vmatmul.mubr.msk.f32.vlgmr.msra.gmra.mrb[26].mxu0 %vm148_vm2, %v2538_v6  ;;  %2894 = vmatmul.mubr.msk.f32.vlgmr.msra.gmra.mrb[24].mxu1 %vm148_vm2, %v2538_v6 }
0x2339   :  { %3496 = vmatpush3.bf16.msra.mxu0 %v4210_v14  ;;  %3119 = vmatprep.mubr.msk.f32.mxu0 %vm3742_vm6, %v3739_v7 }
0x233a   :  { %3497 = vmatprep.subr.bf16.mxu0 %v3741_v23 }
0x233d   :  { %3499 = vmatpush3.bf16.msra.mxu0 %v4216_v15 }
0x233e   :  { %3500 = vmatprep.subr.bf16.mxu0 %v3741_v23 }
0x2341   :  { %3502 = vmatpush3.bf16.msra.mxu0 %v4226_v22 }
0x2342   :  { %3503 = vmatprep.subr.bf16.mxu0 %v3741_v23 }
0x2345   :  { %3505 = vmatpush3.bf16.msra.mxu0 %v4236_v31 }
0x240b   :  { %v4419_v9 = vpop.f32.mrb[26].mxu0  ;;  %v2685_v10 = vpop.f32.mrb[24].mxu1 }
0x240c   :  { %v3102_v8 = vpop.f32.mrb[27].mxu0  ;;  %v2687_v14 = vpop.f32.mrb[25].mxu1  ;;  %v2692_v15 = vrot.slane %v2685_v10, 2 }
0x240d   :  { %v2693_v12 = vrot.slane %v2687_v14, 2 }
0x240e   :  { %v2696_v27 = vadd.f32 %v2692_v15, %v2617_v13 }
0x240f   :  { %v2697_v7 = vadd.f32 %v2693_v12, %v2618_v11 }
0x2410   :  { %v2895_v22 = vmul.f32 -1.442695, %v2696_v27 }
0x2411   :  { %3701 = vtanh.f32 %v2697_v7  ;;  %v2896_v41 = vmul.f32 -1.442695, %v2697_v7 }
0x2412   :  { %3703 = vpow2.f32 %v2895_v22 }
0x241b   :  { %v3702_v16 = vpop.eup %3701 }
0x241c   :  { %2716 = vrot.lane.b32.xlu1 %v3702_v16, %s3740_s29  ;;  %v3704_v23 = vpop.eup %3703 }
0x241d   :  { %v2704_v20 = vadd.f32 1.0, %v3704_v23 }
0x241f   :  { %3705 = vrcp.f32 %v2704_v20 }
0x2429   :  { %v3706_v31 = vpop.eup %3705 }
0x242a   :  { %v2714_v28 = vmul.f32 %v3706_v31, %v2712_v25 }
0x248e   :  { %v2717_v24 = vpop.permute.xlu1 %2716 }
0x248f   :  { %v2719_v21 = vmul.f32 %v3706_v31, %v2717_v24 }
0x2491   :  { %2721 = vrot.lane.b32.xlu0 %v2719_v21, %s3740_s29 }
0x2495   :  { %1437 = vrot.lane.b32.xlu0 %v4271_v51, %s3743_s3 }
0x2499   :  { %1636 = vrot.lane.b32.xlu0 %v4300_v18, %s3744_s14 }
0x249d   :  { %1835 = vrot.lane.b32.xlu0 %v4326_v59, %s3745_s15 }
0x24a1   :  { %2218 = vrot.lane.b32.xlu0 %v4378_v32, %s3745_s15 }
0x24a5   :  { %2415 = vrot.lane.b32.xlu0 %v4403_v17, %s3744_s14 }
0x24a9   :  { %2612 = vrot.lane.b32.xlu0 %v4419_v9, %s3743_s3 }
0x2503   :  { %v2722_v34 = vpop.permute.xlu0 %2721 }
0x2504   :  { %v2724_v35 = vadd.f32 %v2722_v34, %v2714_v28 }
0x2506   :  { %3707 = vtanh.f32 %v2724_v35 }
0x2507   :  { %v1438_v36 = vpop.permute.xlu0 %1437  ;;  %3709 = vpow2.f32 %v2896_v41 }
0x2508   :  { %1441 = vst.msk [vmem:[#allocation6] sm:$0x3] %vm1440_vm8, %v1438_v36 }
0x250b   :  { %v1637_v51 = vpop.permute.xlu0 %1636 }
0x250c   :  { %1640 = vst.msk [vmem:[#allocation6] sm:$0x3] %vm1639_vm9, %v1637_v51 }
0x250f   :  { %v1836_v37 = vpop.permute.xlu0 %1835 }
0x2510   :  { %v3708_v40 = vpop.eup %3707  ;;  %1839 = vst.msk [vmem:[#allocation6] sm:$0x3] %vm1838_vm10, %v1836_v37 }
0x2511   :  { %2727 = vrot.lane.b32.xlu1 %v3708_v40, %s3740_s29  ;;  %v3710_v44 = vpop.eup %3709 }
0x2512   :  { %v2705_v45 = vadd.f32 1.0, %v3710_v44 }
0x2514   :  { %3711 = vrcp.f32 %v2705_v45 }
0x2515   :  { %1631 = vrot.lane.b32.xlu1 %v4300_v18, %s3746_s16  ;;  %v2219_v18 = vpop.permute.xlu0 %2218 }
0x2519   :  { %1830 = vrot.lane.b32.xlu1 %v4326_v59, %s3747_s17 }
0x251d   :  { %2029 = vrot.lane.b32.xlu1 %v4352_v39, %s3748_s18  ;;  %v2416_v39 = vpop.permute.xlu0 %2415 }
0x251e   :  { %v3712_v43 = vpop.eup %3711 }
0x2521   :  { %2222 = vrot.lane.b32.xlu1 %v4378_v32, %s3747_s17 }
0x2525   :  { %2419 = vrot.lane.b32.xlu1 %v4403_v17, %s3746_s16  ;;  %v2613_v17 = vpop.permute.xlu0 %2612 }
0x2583   :  { %v2728_v46 = vpop.permute.xlu1 %2727 }
0x2584   :  { %v2730_v47 = vmul.f32 %v3712_v43, %v2728_v46 }
0x2586   :  { %v2732_v19 = vrot.slane %v2730_v47, 6 }
0x2587   :  { %v1632_v26 = vpop.permute.xlu1 %1631 }
0x2588   :  { %1635 = vst.msk [vmem:[#allocation5] sm:$0x3] %vm1634_vm11, %v1632_v26  ;;  %3120 = vmatmul.mubr.msk.f32.vlgmr.msra.gmra.mrb[28].mxu0 %vm148_vm2, %v2732_v19 }
0x258b   :  { %v1831_v59 = vpop.permute.xlu1 %1830 }
0x258c   :  { %1834 = vst.msk [vmem:[#allocation5] sm:$0x3] %vm1833_vm12, %v1831_v59 }
0x258f   :  { %v2030_v32 = vpop.permute.xlu1 %2029 }
0x2590   :  { %2033 = vst.msk [vmem:[#allocation5] sm:$0x3] %vm2032_vm13, %v2030_v32 }
0x2591   :  { %2035 = vst.msk [vmem:[#allocation6] sm:$0x3] %vm2034_vm14, %v2030_v32  ;;  %2221 = vst.msk [vmem:[#allocation5] sm:$0x3] %vm2034_vm14, %v2219_v18 }
0x2592   :  { %2418 = vst.msk [vmem:[#allocation5] sm:$0x3] %vm1838_vm10, %v2416_v39 }
0x2593   :  { %v2223_v48 = vpop.permute.xlu1 %2222  ;;  %2615 = vst.msk [vmem:[#allocation5] sm:$0x3] %vm1639_vm9, %v2613_v17 }
0x2594   :  { %2225 = vst.msk [vmem:[#allocation6] sm:$0x3] %vm2032_vm13, %v2223_v48 }
0x2597   :  { %v2420_v3 = vpop.permute.xlu1 %2419 }
0x2598   :  { %2422 = vst.msk [vmem:[#allocation6] sm:$0x3] %vm1833_vm12, %v2420_v3 }
0x2599   :  { %2616 = vst.msk [vmem:[#allocation6] sm:$0x3] %vm1634_vm11, %v4419_v9 }
0x265b   :  { %v2801_v50 = vpop.f32.mrb[28].mxu0 }
0x265c   :  { %2810 = vrot.lane.b32.xlu0 %v2801_v50, %s3749_s20  ;;  %2806 = vrot.lane.b32.xlu1 %v2801_v50, %s3750_s21  ;;  %v3121_v33 = vpop.f32.mrb[29].mxu0 }
0x26ce   :  { %v2811_v52 = vpop.permute.xlu0 %2810  ;;  %v2807_v38 = vpop.permute.xlu1 %2806 }
0x26cf   :  { %2813 = vst.msk [vmem:[#allocation6] sm:$0x3] %vm1434_vm7, %v2811_v52 }
0x26d0   :  { %2809 = vst.msk [vmem:[#allocation5] sm:$0x3] %vm1440_vm8, %v2807_v38 }
0x26d6   :  { %v2816_v53 = vld [vmem:[#allocation6] sm:$0x3] }
0x26d7   :  { %v2815_v1 = vld [vmem:[#allocation5] sm:$0x3] }
0x26d8   :  { %v2817_v54 = vadd.f32 %v2816_v53, %v2815_v1 }
0x26da   :  { %v2822_v55 = vadd.f32 %v2820_v42, %v2817_v54 }
0x26dc   :  { %3713 = vtanh.f32 %v2822_v55 }
0x26e6   :  { %v3714_v56 = vpop.eup %3713 }
0x26e7   :  { %2825 = vst.msk [vmem:[#allocation7] sm:$0x3] %vm2824_vm15, %v3714_v56 }
0x26e8   :  { %3726 = shalt.err (!%p3723_p4)
}
0x26e9   :  { %s3727_s26 = scalar_lea.hbm %s4467_s4, 32 }
0x26ea   :  { %p3728_p5 = scmp.ne.s32.totalorder %s4467_s4, %s3727_s26  ;;  %p3731_p6 = scmp.lt.u32.totalorder %s3727_s26, %s4467_s4 }
0x26ec   :  { %p3733_p7 = pnand %p3731_p6, %p3728_p5 }
0x26ee   :  { %3736 = shalt.err (!%p3733_p7)
}
0x26ef   :  { %2835 = dma.vmem_to_hbm [thread:$0]  %s2833_s1, 32, %s4467_s4, [#allocation8]  }
0x26f0   :  { %3737 = dma.done.wait [#allocation8], 32  }
0x26f1   :  { %3738 = vsyncadd [#allocation8], 4294967264 }
0x26f2   :  { %2839 = vsyncpa [#allocation8], 1 }

</bundles_post_ra>
